<compile_context>
chip_gen: v5e
topology: v5e:2x2
jax: 0.10.0
libtpu: 0.0.40
codegen_flags: <defaults>
</compile_context>

<pallas_src>
import functools

import jax
import jax.numpy as jnp
from jax.experimental import pallas as pl
from jax.experimental.pallas import tpu as pltpu


def _round_up(x, m):
    return ((x + m - 1) // m) * m


def _choose_block_b(B, block_b):
    """Pick the batch tile: multiple of 128, <= padded batch, and small enough
    that the grid has >=2 steps when B > 128 (so v7x's two TensorCores both
    get work via the 'parallel' batch axis)."""
    bb = _round_up(max(block_b, 128), 128)
    if B > 128:
        bb = min(bb, _round_up(pl.cdiv(B, 2), 128))
    bb = min(bb, _round_up(B, 128))
    return max(bb, 128)


def _mlp_kernel(x_ref, w1_ref, b1_ref, w2_ref, b2_ref, w3_ref, b3_ref, o_ref):
    """Fused 3-layer MLP on a (bb, E) batch tile, transposed internally.

    Shapes (per grid step):
      x_ref : (bb, E)   input dtype (f32); cast in-kernel to the weight dtype
      w1_ref: (H, E)    torch layout [out, in], compute dtype
      b1_ref: (H, 1)    f32
      w2_ref: (H, H)    torch layout, compute dtype
      b2_ref: (H, 1)    f32
      w3_ref: (H, 1)    f32 (head column)
      b3_ref: (1, 1)    f32
      o_ref : (1, bb)   f32  -- lane-dense output tile (batch on lanes)

    NOTE: every output lane column depends on exactly one input row; the
    ragged last batch tile relies on this -- never add a cross-batch
    reduction to this kernel.
    """
    # In-kernel cast (no-op for the f32 path, free VPU work for bf16).
    x = x_ref[...].astype(w1_ref.dtype)                          # (bb, E)

    # h1^T = W1 . x^T : contract E (last dim of both operands).
    h1 = jax.lax.dot_general(
        w1_ref[...], x, (((1,), (1,)), ((), ())),
        preferred_element_type=jnp.float32)                      # (H, bb) f32
    h1 = jnp.maximum(h1 + b1_ref[...], 0.0)                      # ReLU

    # h2^T = W2 . h1^T
    h2 = jnp.dot(w2_ref[...], h1.astype(w2_ref.dtype),
                 preferred_element_type=jnp.float32)             # (H, bb) f32
    h2 = jnp.maximum(h2 + b2_ref[...], 0.0)                      # ReLU

    # Head Linear(H -> 1): VPU multiply + sublane (XLU) reduce; batch stays on
    # lanes, so the result is already the lane-dense (1, bb) output tile.
    score = jnp.sum(h2 * w3_ref[...], axis=0, keepdims=True)     # (1, bb) f32
    o_ref[...] = (score + b3_ref[...]).astype(o_ref.dtype)


@functools.partial(jax.jit, static_argnames=("block_b", "compute_dtype"))
def mlp_forward(encoding, w1, b1, w2, b2, w3, b3, *,
                block_b=4096, compute_dtype=jnp.float32):
    """encoding: (B, E). Weights in torch nn.Linear layout:
    w1 (H, E), b1 (H,), w2 (H, H), b2 (H,), w3 (1, H), b3 (1,).
    Returns (B, 1) f32 scores."""
    B, E = encoding.shape
    H = w1.shape[0]

    bb = _choose_block_b(B, block_b)
    grid_b = pl.cdiv(B, bb)
    B_pad = grid_b * bb   # only the tiny output slab is padded, never the input

    # Resident weights: casting them in the wrapper is negligible (H*E + H*H
    # elements); activations are NOT cast or padded outside the kernel.
    w1c = w1.astype(compute_dtype)
    w2c = w2.astype(compute_dtype)
    b1c = b1.reshape(H, 1).astype(jnp.float32)
    b2c = b2.reshape(H, 1).astype(jnp.float32)
    w3c = w3.reshape(H, 1).astype(jnp.float32)
    b3c = b3.reshape(1, 1).astype(jnp.float32)

    cost = pl.CostEstimate(
        flops=2 * B * (E * H + H * H + H),
        transcendentals=0,
        bytes_accessed=int(
            B * E * encoding.dtype.itemsize          # activation stream (unpadded)
            + (H * E + H * H) * w1c.dtype.itemsize   # resident weights
            + (3 * H + 1) * 4                        # biases + head column
            + B_pad * 4                              # scores out
        ),
    )

    out = pl.pallas_call(
        _mlp_kernel,
        out_shape=jax.ShapeDtypeStruct((1, B_pad), jnp.float32),
        grid_spec=pltpu.PrefetchScalarGridSpec(
            num_scalar_prefetch=0,
            grid=(grid_b,),
            in_specs=[
                # Activations tiled over batch; the last (ragged) block's OOB
                # rows are undefined but only feed padded output columns.
                pl.BlockSpec((bb, E), lambda i: (i, 0)),
                pl.BlockSpec((H, E), lambda i: (0, 0)),    # W1 resident
                pl.BlockSpec((H, 1), lambda i: (0, 0)),    # b1
                pl.BlockSpec((H, H), lambda i: (0, 0)),    # W2 resident
                pl.BlockSpec((H, 1), lambda i: (0, 0)),    # b2
                pl.BlockSpec((H, 1), lambda i: (0, 0)),    # w3 head column
                pl.BlockSpec((1, 1), lambda i: (0, 0)),    # b3
            ],
            out_specs=pl.BlockSpec((1, bb), lambda i: (0, i)),  # lane-dense tiles
        ),
        compiler_params=pltpu.CompilerParams(
            # Batch tiles are independent -> shard across TensorCores (v7x).
            dimension_semantics=("parallel",),
            # Default scoped VMEM (32 MiB) covers bb<=8192 at E=32/H=128
            # (x double-buffer ~2*bb*128*4 B + h1/h2 temps ~2*H*bb*4 B +
            # ~200 KB weights). Raise vmem_limit_bytes only beyond that, and
            # remember v7x has 64 MiB physical vs 128 MiB on v5e/v6e.
        ),
        cost_estimate=cost,
    )(encoding, w1c, b1c, w2c, b2c, w3c, b3c)

    # (1, B_pad) lane-major scores -> (B, 1), matching the PyTorch module.
    return out.reshape(B_pad, 1)[:B]


def init_mlp_params(key, encoding_dim, hidden_dim=128, output_dim=1,
                    dtype=jnp.float32):
    """Mirror init_weights(): truncated-normal weights (std = 1/(2*sqrt(in)),
    clipped at +/-2 std) and zero biases. Torch nn.Linear layout [out, in]."""
    k1, k2, k3 = jax.random.split(key, 3)

    def trunc(k, out_dim, in_dim):
        std = 1.0 / (2.0 * jnp.sqrt(jnp.asarray(in_dim, jnp.float32)))
        w = jax.random.truncated_normal(k, -2.0, 2.0, (out_dim, in_dim)) * std
        return w.astype(dtype)

    w1 = trunc(k1, hidden_dim, encoding_dim)
    b1 = jnp.zeros((hidden_dim,), dtype)
    w2 = trunc(k2, hidden_dim, hidden_dim)
    b2 = jnp.zeros((hidden_dim,), dtype)
    w3 = trunc(k3, output_dim, hidden_dim)
    b3 = jnp.zeros((output_dim,), dtype)
    return w1, b1, w2, b2, w3, b3


def mlp_forward_ref(encoding, w1, b1, w2, b2, w3, b3):
    """Pure-JAX reference (torch-layout weights)."""
    x = jnp.maximum(encoding @ w1.T + b1, 0.0)
    x = jnp.maximum(x @ w2.T + b2, 0.0)
    return x @ w3.T + b3


if __name__ == "__main__":
    key = jax.random.PRNGKey(0)
    k_in, k_params = jax.random.split(key)

    # Non-multiple batch exercises the ragged last tile (no wrapper padding);
    # bb is clamped to ceil(B/2) rounded to 128 -> 2 grid steps (both v7x TCs).
    batch, encoding_dim, hidden_dim = 1000, 32, 128
    encoding = jax.random.normal(k_in, (batch, encoding_dim), jnp.float32)
    params = init_mlp_params(k_params, encoding_dim, hidden_dim)

    ref = mlp_forward_ref(encoding, *params)

    # f32 path (default: full-precision scores).
    score = jax.block_until_ready(mlp_forward(encoding, *params))
    assert score.shape == (batch, 1), score.shape
    assert jnp.allclose(score, ref, atol=1e-4, rtol=1e-4), (
        f"f32 mismatch: max abs err {jnp.max(jnp.abs(score - ref))}"
    )

    # bf16 MXU path (throughput win on v5e/v6e/v7x), f32 accumulation,
    # in-kernel activation cast -> looser tolerance.
    score_bf16 = jax.block_until_ready(
        mlp_forward(encoding, *params, compute_dtype=jnp.bfloat16))
    assert score_bf16.shape == (batch, 1), score_bf16.shape
    assert jnp.allclose(score_bf16, ref, atol=2e-2, rtol=2e-2), (
        f"bf16 mismatch: max abs err {jnp.max(jnp.abs(score_bf16 - ref))}"
    )

    print("KERNEL_OK")
</pallas_src>

<mosaic_0001>
module attributes {stable_mosaic.version = 11 : i64} {
  func.func @_mlp_kernel(%arg0: i32, %arg1: memref<512x32xf32, #tpu.memory_space<vmem>>, %arg2: memref<128x32xf32, #tpu.memory_space<vmem>>, %arg3: memref<128x1xf32, #tpu.memory_space<vmem>>, %arg4: memref<128x128xf32, #tpu.memory_space<vmem>>, %arg5: memref<128x1xf32, #tpu.memory_space<vmem>>, %arg6: memref<128x1xf32, #tpu.memory_space<vmem>>, %arg7: memref<1x1xf32, #tpu.memory_space<vmem>>, %arg8: memref<1x512xf32, #tpu.memory_space<vmem>>) attributes {dimension_semantics = [#tpu.dimension_semantics<parallel>], iteration_bounds = array<i64: 2>, scalar_prefetch = 0 : i64, scratch_operands = 0 : i64, tpu.core_type = #tpu.core_type<tc>, window_params = [{transform_indices = @transform_0, window_bounds = array<i64: 512, 32>}, {pipeline_mode = #tpu.pipeline_mode<synchronous>, transform_indices = @transform_1, window_bounds = array<i64: 128, 32>}, {pipeline_mode = #tpu.pipeline_mode<synchronous>, transform_indices = @transform_2, window_bounds = array<i64: 128, 1>}, {pipeline_mode = #tpu.pipeline_mode<synchronous>, transform_indices = @transform_3, window_bounds = array<i64: 128, 128>}, {pipeline_mode = #tpu.pipeline_mode<synchronous>, transform_indices = @transform_4, window_bounds = array<i64: 128, 1>}, {pipeline_mode = #tpu.pipeline_mode<synchronous>, transform_indices = @transform_5, window_bounds = array<i64: 128, 1>}, {pipeline_mode = #tpu.pipeline_mode<synchronous>, transform_indices = @transform_6, window_bounds = array<i64: 1, 1>}, {transform_indices = @transform_7, window_bounds = array<i64: 1, 512>}]} {
    %c0 = arith.constant 0 : index
    %c0_0 = arith.constant 0 : index
    %0 = vector.load %arg1[%c0, %c0_0] : memref<512x32xf32, #tpu.memory_space<vmem>>, vector<512x32xf32>
    %c0_1 = arith.constant 0 : index
    %c0_2 = arith.constant 0 : index
    %1 = vector.load %arg2[%c0_1, %c0_2] : memref<128x32xf32, #tpu.memory_space<vmem>>, vector<128x32xf32>
    %cst = arith.constant dense<0.000000e+00> : vector<128x512xf32>
    %2 = tpu.matmul %1, %0, %cst {dimension_numbers = #tpu.dot_dimension_numbers<[1], [1], [0], [0], [0, 0, 1, 0], [], []>} : vector<128x32xf32>, vector<512x32xf32>, vector<128x512xf32> -> vector<128x512xf32>
    %c0_3 = arith.constant 0 : index
    %c0_4 = arith.constant 0 : index
    %3 = vector.load %arg3[%c0_3, %c0_4] : memref<128x1xf32, #tpu.memory_space<vmem>>, vector<128x1xf32>
    %4 = vector.broadcast %3 : vector<128x1xf32> to vector<128x512xf32>
    %5 = arith.addf %2, %4 : vector<128x512xf32>
    %cst_5 = arith.constant 0.000000e+00 : f32
    %6 = vector.broadcast %cst_5 : f32 to vector<128x512xf32>
    %7 = arith.maximumf %5, %6 : vector<128x512xf32>
    %c0_6 = arith.constant 0 : index
    %c0_7 = arith.constant 0 : index
    %8 = vector.load %arg4[%c0_6, %c0_7] : memref<128x128xf32, #tpu.memory_space<vmem>>, vector<128x128xf32>
    %cst_8 = arith.constant dense<0.000000e+00> : vector<128x512xf32>
    %9 = tpu.matmul %8, %7, %cst_8 {dimension_numbers = #tpu.dot_dimension_numbers<[1], [0], [0], [1], [0, 0, 1, 1], [], []>} : vector<128x128xf32>, vector<128x512xf32>, vector<128x512xf32> -> vector<128x512xf32>
    %c0_9 = arith.constant 0 : index
    %c0_10 = arith.constant 0 : index
    %10 = vector.load %arg5[%c0_9, %c0_10] : memref<128x1xf32, #tpu.memory_space<vmem>>, vector<128x1xf32>
    %11 = vector.broadcast %10 : vector<128x1xf32> to vector<128x512xf32>
    %12 = arith.addf %9, %11 : vector<128x512xf32>
    %cst_11 = arith.constant 0.000000e+00 : f32
    %13 = vector.broadcast %cst_11 : f32 to vector<128x512xf32>
    %14 = arith.maximumf %12, %13 : vector<128x512xf32>
    %c0_12 = arith.constant 0 : index
    %c0_13 = arith.constant 0 : index
    %15 = vector.load %arg6[%c0_12, %c0_13] : memref<128x1xf32, #tpu.memory_space<vmem>>, vector<128x1xf32>
    %16 = vector.broadcast %15 : vector<128x1xf32> to vector<128x512xf32>
    %17 = arith.mulf %14, %16 : vector<128x512xf32>
    %cst_14 = arith.constant dense<0.000000e+00> : vector<512xf32>
    %18 = vector.multi_reduction <add>, %17, %cst_14 [0] : vector<128x512xf32> to vector<512xf32>
    %19 = vector.shape_cast %18 : vector<512xf32> to vector<1x512xf32>
    %c0_15 = arith.constant 0 : index
    %c0_16 = arith.constant 0 : index
    %20 = vector.load %arg7[%c0_15, %c0_16] : memref<1x1xf32, #tpu.memory_space<vmem>>, vector<1x1xf32>
    %21 = vector.broadcast %20 : vector<1x1xf32> to vector<1x512xf32>
    %22 = arith.addf %19, %21 : vector<1x512xf32>
    %c0_17 = arith.constant 0 : index
    %c0_18 = arith.constant 0 : index
    %23 = vector.load %arg8[%c0_17, %c0_18] : memref<1x512xf32, #tpu.memory_space<vmem>>, vector<1x512xf32>
    tpu.vector_store %arg8[%c0_17, %c0_18], %22 {strides = array<i32>} : memref<1x512xf32, #tpu.memory_space<vmem>>, vector<1x512xf32>,
    return
  }
  func.func @transform_0(%arg0: i32) -> (i32, i32) {
    %c0_i32 = arith.constant 0 : i32
    %c0_i32_0 = arith.constant 0 : i32
    return %arg0, %c0_i32 : i32, i32
  }
  func.func @transform_1(%arg0: i32) -> (i32, i32) {
    %c0_i32 = arith.constant 0 : i32
    %c0_i32_0 = arith.constant 0 : i32
    %c0_i32_1 = arith.constant 0 : i32
    return %c0_i32, %c0_i32_0 : i32, i32
  }
  func.func @transform_2(%arg0: i32) -> (i32, i32) {
    %c0_i32 = arith.constant 0 : i32
    %c0_i32_0 = arith.constant 0 : i32
    %c0_i32_1 = arith.constant 0 : i32
    return %c0_i32, %c0_i32_0 : i32, i32
  }
  func.func @transform_3(%arg0: i32) -> (i32, i32) {
    %c0_i32 = arith.constant 0 : i32
    %c0_i32_0 = arith.constant 0 : i32
    %c0_i32_1 = arith.constant 0 : i32
    return %c0_i32, %c0_i32_0 : i32, i32
  }
  func.func @transform_4(%arg0: i32) -> (i32, i32) {
    %c0_i32 = arith.constant 0 : i32
    %c0_i32_0 = arith.constant 0 : i32
    %c0_i32_1 = arith.constant 0 : i32
    return %c0_i32, %c0_i32_0 : i32, i32
  }
  func.func @transform_5(%arg0: i32) -> (i32, i32) {
    %c0_i32 = arith.constant 0 : i32
    %c0_i32_0 = arith.constant 0 : i32
    %c0_i32_1 = arith.constant 0 : i32
    return %c0_i32, %c0_i32_0 : i32, i32
  }
  func.func @transform_6(%arg0: i32) -> (i32, i32) {
    %c0_i32 = arith.constant 0 : i32
    %c0_i32_0 = arith.constant 0 : i32
    %c0_i32_1 = arith.constant 0 : i32
    return %c0_i32, %c0_i32_0 : i32, i32
  }
  func.func @transform_7(%arg0: i32) -> (i32, i32) {
    %c0_i32 = arith.constant 0 : i32
    %c0_i32_0 = arith.constant 0 : i32
    return %c0_i32, %arg0 : i32, i32
  }
}

</mosaic_0001>

<bundles_post_ra>
// kernel: mlp_forward.1
= control target key start
LH: loop header
LB: loop body
LE: loop exit
PB: predicated region body
PF: predicated region fallthrough
CT: control target
= control target key end

     0   :  { %s2005_s26 = smov 0   ;;  %s2808_s0 = inlined_call_operand.vmem [shape: f32[1000,32], index: 0, kind: input, shape index: {}]   ;;  %s2809_s1 = inlined_call_operand.vmem [shape: f32[128,32], index: 1, kind: input, shape index: {}]   ;;  %s2810_s2 = inlined_call_operand.vmem [shape: f32[128,1], index: 2, kind: input, shape index: {}]   ;;  %s2811_s3 = inlined_call_operand.vmem [shape: f32[128,128], index: 3, kind: input, shape index: {}]   ;;  %s2812_s4 = inlined_call_operand.vmem [shape: f32[128,1], index: 4, kind: input, shape index: {}]   ;;  %s2813_s5 = inlined_call_operand.vmem [shape: f32[128,1], index: 5, kind: input, shape index: {}]   ;;  %s2814_s6 = inlined_call_operand.<no memory space> [shape: f32[1,1], index: 6, kind: input, shape index: {}]   ;;  %s2815_s7 = inlined_call_operand.vmem [shape: f32[1,1024], index: 7, kind: output, shape index: {}]  }
   0x1   :  { %v12_v0 = vstv %s2814_s6 }
   0x2   :  { %13 = vst [vmem:[#allocation2] sm:$0x1] %v12_v0 }
   0x3 LB: > { %s1803_s27 = sadd.s32 4294967295, %s1959_s26   ;;  %p1807_p0 = scmp.ge.s32.totalorder %s1959_s26, 1  ;;  %s1959_s26 = sphi %s2005_s26, %s19_s26  }
   0x4   : > { %p248_p1 = scmp.lt.s32.totalorder %s1959_s26, 3 }
   0x6   : > { %p249_p2 = pnand %p1807_p0, %p248_p1 }
   0x8   : > { %252 = sbr.rel (%p249_p2) target bundleno = 652 (0x28c), region = 48 }
   0xd   : > { %s1808_s28 = sshll.u32 %s1803_s27, 6  ;;  %vm478_vm0 = vcmask 261120   ;;  %v1961_v13 = vmov 0   ;;  %v397_v18 = vld [vmem:[%s2810_s2 + $0x78] sm:$0xff]  ;;  %v396_v27 = vld [vmem:[%s2810_s2 + $0x70] sm:$0xff]  ;;  %v391_v36 = vld [vmem:[%s2810_s2 + $0x48] sm:$0xff] }
   0xe   : > { %p288_p3 = scmp.lt.s32.totalorder %s1808_s28, 124  ;;  %1950 = vset.pattern.permute.xlu0 %v1961_v13  ;;  %1951 = vset.pattern.permute.xlu1 %v1961_v13  ;;  %v395_v41 = vld [vmem:[%s2810_s2 + $0x68] sm:$0xff]  ;;  %v388_v46 = vld [vmem:[%s2810_s2 + $0x30] sm:$0xff]  ;;  %v394_v51 = vld [vmem:[%s2810_s2 + $0x60] sm:$0xff]  ;;  %vm1741_vm1 = vcmask 1040384   ;;  %s1810_s15 = sshll.u32 %s1803_s27, 2 }
   0xf   : > { %1952 = vset.pattern.permute.xlu2 %v1961_v13  ;;  %475 = vperm.xlu0 %1950, %v397_v18   ;;  %v385_v56 = vld [vmem:[%s2810_s2 + $0x18] sm:$0xff]  ;;  %v390_v62 = vld [vmem:[%s2810_s2 + $0x40] sm:$0xff]  ;;  %p298_p4 = scmp.lt.s32.totalorder %s1810_s15, 7  ;;  %vm1743_vm2 = vcmask 1042434   ;;  %vm1745_vm3 = vcmask 1041408  }
  0x10   : > { %s2857_s28 = smov (!%p288_p3, %s1808_s28), 124  ;;  %465 = vperm.xlu1 %1951, %v395_v41   ;;  %v393_v61 = vld [vmem:[%s2810_s2 + $0x58] sm:$0xff]  ;;  %v386_v18 = vld [vmem:[%s2810_s2 + $0x20] sm:$0xff] }
  0x11   : > { %s1809_s6 = sshll.u32 %s2857_s28, 3  ;;  %455 = vperm.xlu2 %1952, %v393_v61   ;;  %v1066_v41 = vld [vmem:[%s2812_s4 + $0x38] sm:$0xff]  ;;  %v1485_v61 = vld [vmem:[%s2813_s5 + $0x30] sm:$0xff]  ;;  %s2859_s15 = smov (!%p298_p4, %s1810_s15), 7 }
  0x12   : > { %s2018_s8 = scalar_lea.vmem %s2808_s0, %s1809_s6  ;;  %s300_s27 = scalar_lea.vmem %s2815_s7, %s2859_s15 }
  0x13   : > { %v317_v1 = vld [vmem:[%s2018_s8 + $0x78] sm:$0xff]  ;;  %v316_v5 = vld [vmem:[%s2018_s8 + $0x70] sm:$0xff]  ;;  %v315_v9 = vld [vmem:[%s2018_s8 + $0x68] sm:$0xff] }
  0x14   : > { %v333_v2 = vld [vmem:[%s2018_s8 + $0xf8] sm:$0xff]  ;;  %1811 = vmatpush.xpose.msk.msra.mxu0 %vm478_vm0, %v317_v1  ;;  %v332_v6 = vld [vmem:[%s2018_s8 + $0xf0] sm:$0xff]  ;;  %v331_v10 = vld [vmem:[%s2018_s8 + $0xe8] sm:$0xff] }
  0x15   : > { %v349_v3 = vld [vmem:[%s2018_s8 + $0x178] sm:$0xff]  ;;  %1843 = vmatpush.xpose.msk.msra.mxu1 %vm478_vm0, %v333_v2  ;;  %v348_v7 = vld [vmem:[%s2018_s8 + $0x170] sm:$0xff]  ;;  %v347_v11 = vld [vmem:[%s2018_s8 + $0x168] sm:$0xff] }
  0x16   : > { %v365_v4 = vld [vmem:[%s2018_s8 + $0x1f8] sm:$0xff]  ;;  %1875 = vmatpush.xpose.msk.msra.mxu2 %vm478_vm0, %v349_v3  ;;  %v364_v8 = vld [vmem:[%s2018_s8 + $0x1f0] sm:$0xff]  ;;  %v363_v12 = vld [vmem:[%s2018_s8 + $0x1e8] sm:$0xff] }
  0x17   : > { %1907 = vmatpush.xpose.msk.msra.mxu3 %vm478_vm0, %v365_v4  ;;  %v314_v14 = vld [vmem:[%s2018_s8 + $0x60] sm:$0xff]  ;;  %v313_v19 = vld [vmem:[%s2018_s8 + $0x58] sm:$0xff]  ;;  %v312_v23 = vld [vmem:[%s2018_s8 + $0x50] sm:$0xff]  ;;  %470 = vperm.xlu0 %1950, %v396_v27  }
  0x18   : > { %1812 = vmatpush.xpose.msk.msra.mxu0 %vm478_vm0, %v316_v5  ;;  %v330_v15 = vld [vmem:[%s2018_s8 + $0xe0] sm:$0xff]  ;;  %v329_v20 = vld [vmem:[%s2018_s8 + $0xd8] sm:$0xff]  ;;  %v328_v24 = vld [vmem:[%s2018_s8 + $0xd0] sm:$0xff]  ;;  %460 = vperm.xlu1 %1951, %v394_v51  }
  0x19   : > { %1844 = vmatpush.xpose.msk.msra.mxu1 %vm478_vm0, %v332_v6  ;;  %v346_v16 = vld [vmem:[%s2018_s8 + $0x160] sm:$0xff]  ;;  %v345_v21 = vld [vmem:[%s2018_s8 + $0x158] sm:$0xff]  ;;  %v344_v25 = vld [vmem:[%s2018_s8 + $0x150] sm:$0xff] }
  0x1a   : > { %1876 = vmatpush.xpose.msk.msra.mxu2 %vm478_vm0, %v348_v7  ;;  %v362_v17 = vld [vmem:[%s2018_s8 + $0x1e0] sm:$0xff]  ;;  %v361_v22 = vld [vmem:[%s2018_s8 + $0x1d8] sm:$0xff]  ;;  %v360_v26 = vld [vmem:[%s2018_s8 + $0x1d0] sm:$0xff] }
  0x1b   : > { %1908 = vmatpush.xpose.msk.msra.mxu3 %vm478_vm0, %v364_v8  ;;  %v311_v28 = vld [vmem:[%s2018_s8 + $0x48] sm:$0xff]  ;;  %v310_v32 = vld [vmem:[%s2018_s8 + $0x40] sm:$0xff]  ;;  %v309_v37 = vld [vmem:[%s2018_s8 + $0x38] sm:$0xff] }
  0x1c   : > { %1813 = vmatpush.xpose.msk.msra.mxu0 %vm478_vm0, %v315_v9  ;;  %v327_v29 = vld [vmem:[%s2018_s8 + $0xc8] sm:$0xff]  ;;  %v326_v33 = vld [vmem:[%s2018_s8 + $0xc0] sm:$0xff]  ;;  %v325_v38 = vld [vmem:[%s2018_s8 + $0xb8] sm:$0xff] }
  0x1d   : > { %1845 = vmatpush.xpose.msk.msra.mxu1 %vm478_vm0, %v331_v10  ;;  %v343_v30 = vld [vmem:[%s2018_s8 + $0x148] sm:$0xff]  ;;  %v342_v34 = vld [vmem:[%s2018_s8 + $0x140] sm:$0xff]  ;;  %v341_v39 = vld [vmem:[%s2018_s8 + $0x138] sm:$0xff] }
  0x1e   : > { %1877 = vmatpush.xpose.msk.msra.mxu2 %vm478_vm0, %v347_v11  ;;  %v359_v31 = vld [vmem:[%s2018_s8 + $0x1c8] sm:$0xff]  ;;  %v358_v35 = vld [vmem:[%s2018_s8 + $0x1c0] sm:$0xff]  ;;  %v357_v40 = vld [vmem:[%s2018_s8 + $0x1b8] sm:$0xff] }
  0x1f   : > { %1909 = vmatpush.xpose.msk.msra.mxu3 %vm478_vm0, %v363_v12  ;;  %445 = vperm.xlu0 %1950, %v391_v36   ;;  %v308_v42 = vld [vmem:[%s2018_s8 + $0x30] sm:$0xff]  ;;  %v307_v47 = vld [vmem:[%s2018_s8 + $0x28] sm:$0xff]  ;;  %v306_v52 = vld [vmem:[%s2018_s8 + $0x20] sm:$0xff] }
  0x20   : > { %1814 = vmatpush.xpose.msk.msra.mxu0 %vm478_vm0, %v314_v14  ;;  %v324_v43 = vld [vmem:[%s2018_s8 + $0xb0] sm:$0xff]  ;;  %v323_v48 = vld [vmem:[%s2018_s8 + $0xa8] sm:$0xff]  ;;  %v322_v53 = vld [vmem:[%s2018_s8 + $0xa0] sm:$0xff]  ;;  %440 = vperm.xlu1 %1951, %v390_v62  }
  0x21   : > { %1846 = vmatpush.xpose.msk.msra.mxu1 %vm478_vm0, %v330_v15  ;;  %v340_v44 = vld [vmem:[%s2018_s8 + $0x130] sm:$0xff]  ;;  %v339_v49 = vld [vmem:[%s2018_s8 + $0x128] sm:$0xff]  ;;  %v338_v54 = vld [vmem:[%s2018_s8 + $0x120] sm:$0xff] }
  0x22   : > { %1878 = vmatpush.xpose.msk.msra.mxu2 %vm478_vm0, %v346_v16  ;;  %v356_v45 = vld [vmem:[%s2018_s8 + $0x1b0] sm:$0xff]  ;;  %v355_v50 = vld [vmem:[%s2018_s8 + $0x1a8] sm:$0xff]  ;;  %v354_v55 = vld [vmem:[%s2018_s8 + $0x1a0] sm:$0xff] }
  0x23   : > { %1910 = vmatpush.xpose.msk.msra.mxu3 %vm478_vm0, %v362_v17  ;;  %v305_v57 = vld [vmem:[%s2018_s8 + $0x18] sm:$0xff]  ;;  %v304_v63 = vld [vmem:[%s2018_s8 + $0x10] sm:$0xff]  ;;  %v382_v3 = vld [vmem:[%s2810_s2] sm:$0xff] }
  0x24   : > { %1815 = vmatpush.xpose.msk.msra.mxu0 %vm478_vm0, %v313_v19  ;;  %v321_v58 = vld [vmem:[%s2018_s8 + $0x98] sm:$0xff]  ;;  %v320_v0 = vld [vmem:[%s2018_s8 + $0x90] sm:$0xff]  ;;  %v303_v4 = vld [vmem:[%s2018_s8 + $0x8] sm:$0xff] }
  0x25   : > { %1847 = vmatpush.xpose.msk.msra.mxu1 %vm478_vm0, %v329_v20  ;;  %v337_v59 = vld [vmem:[%s2018_s8 + $0x118] sm:$0xff]  ;;  %v336_v1 = vld [vmem:[%s2018_s8 + $0x110] sm:$0xff]  ;;  %v319_v5 = vld [vmem:[%s2018_s8 + $0x88] sm:$0xff] }
  0x26   : > { %1879 = vmatpush.xpose.msk.msra.mxu2 %vm478_vm0, %v345_v21  ;;  %v353_v60 = vld [vmem:[%s2018_s8 + $0x198] sm:$0xff]  ;;  %v352_v2 = vld [vmem:[%s2018_s8 + $0x190] sm:$0xff]  ;;  %v335_v6 = vld [vmem:[%s2018_s8 + $0x108] sm:$0xff] }
  0x27   : > { %1911 = vmatpush.xpose.msk.msra.mxu3 %vm478_vm0, %v361_v22  ;;  %430 = vperm.xlu0 %1950, %v388_v46   ;;  %v351_v7 = vld [vmem:[%s2018_s8 + $0x188] sm:$0xff]  ;;  %v392_v8 = vld [vmem:[%s2810_s2 + $0x50] sm:$0xff]  ;;  %v302_v10 = vld [vmem:[%s2018_s8] sm:$0xff] }
  0x28   : > { %1816 = vmatpush.xpose.msk.msra.mxu0 %vm478_vm0, %v312_v23  ;;  %v387_v9 = vld [vmem:[%s2810_s2 + $0x28] sm:$0xff]  ;;  %v318_v11 = vld [vmem:[%s2018_s8 + $0x80] sm:$0xff]  ;;  %450 = vperm.xlu2 %1952, %v392_v8   ;;  %v389_v15 = vld [vmem:[%s2810_s2 + $0x38] sm:$0xff] }
  0x29   : > { %1848 = vmatpush.xpose.msk.msra.mxu1 %vm478_vm0, %v328_v24  ;;  %v334_v12 = vld [vmem:[%s2018_s8 + $0x100] sm:$0xff]  ;;  %425 = vperm.xlu1 %1951, %v387_v9   ;;  %v384_v16 = vld [vmem:[%s2810_s2 + $0x10] sm:$0xff]  ;;  %v367_v17 = vld [vmem:[%s2809_s1 + $0x8] sm:$0xff] }
  0x2a   : > { %1880 = vmatpush.xpose.msk.msra.mxu2 %vm478_vm0, %v344_v25  ;;  %v350_v13 = vld [vmem:[%s2018_s8 + $0x180] sm:$0xff]  ;;  %v368_v19 = vld [vmem:[%s2809_s1 + $0x10] sm:$0xff]  ;;  %v383_v21 = vld [vmem:[%s2810_s2 + $0x8] sm:$0xff] }
  0x2b   : > { %1912 = vmatpush.xpose.msk.msra.mxu3 %vm478_vm0, %v360_v26  ;;  %v366_v14 = vld [vmem:[%s2809_s1] sm:$0xff]  ;;  %v1061_v20 = vld [vmem:[%s2812_s4 + $0x10] sm:$0xff]  ;;  %v369_v23 = vld [vmem:[%s2809_s1 + $0x18] sm:$0xff] }
  0x2c   : > { %1817 = vmatpush.xpose.msk.msra.mxu0 %vm478_vm0, %v311_v28  ;;  %v1059_v22 = vld [vmem:[%s2812_s4] sm:$0xff]  ;;  %v1064_v24 = vld [vmem:[%s2812_s4 + $0x28] sm:$0xff]  ;;  %v1062_v25 = vld [vmem:[%s2812_s4 + $0x18] sm:$0xff] }
  0x2d   : > { %1849 = vmatpush.xpose.msk.msra.mxu1 %vm478_vm0, %v327_v29  ;;  %v370_v26 = vld [vmem:[%s2809_s1 + $0x20] sm:$0xff]  ;;  %v1065_v28 = vld [vmem:[%s2812_s4 + $0x30] sm:$0xff]  ;;  %v371_v29 = vld [vmem:[%s2809_s1 + $0x28] sm:$0xff] }
  0x2e   : > { %1881 = vmatpush.xpose.msk.msra.mxu2 %vm478_vm0, %v343_v30  ;;  %v1067_v27 = vld [vmem:[%s2812_s4 + $0x40] sm:$0xff]  ;;  %v1070_v30 = vld [vmem:[%s2812_s4 + $0x58] sm:$0xff]  ;;  %v380_v62 = vld [vmem:[%s2809_s1 + $0x70] sm:$0xff] }
  0x2f   : > { %1913 = vmatpush.xpose.msk.msra.mxu3 %vm478_vm0, %v359_v31  ;;  %415 = vperm.xlu0 %1950, %v385_v56   ;;  %v1068_v31 = vld [vmem:[%s2812_s4 + $0x48] sm:$0xff]  ;;  %v373_v36 = vld [vmem:[%s2809_s1 + $0x38] sm:$0xff]  ;;  %v1487_v51 = vld [vmem:[%s2813_s5 + $0x40] sm:$0xff] }
  0x30   : > { %1818 = vmatpush.xpose.msk.msra.mxu0 %vm478_vm0, %v310_v32  ;;  %435 = vperm.xlu2 %1952, %v389_v15   ;;  %v372_v32 = vld [vmem:[%s2809_s1 + $0x30] sm:$0xff]  ;;  %v1486_v46 = vld [vmem:[%s2813_s5 + $0x38] sm:$0xff]  ;;  %v378_v56 = vld [vmem:[%s2809_s1 + $0x60] sm:$0xff] }
  0x31   : > { %1850 = vmatpush.xpose.msk.msra.mxu1 %vm478_vm0, %v326_v33  ;;  %410 = vperm.xlu1 %1951, %v384_v16   ;;  %v1060_v33 = vld [vmem:[%s2812_s4 + $0x8] sm:$0xff] }
  0x32   : > { %1882 = vmatpush.xpose.msk.msra.mxu2 %vm478_vm0, %v342_v34  ;;  %v1073_v34 = vld [vmem:[%s2812_s4 + $0x70] sm:$0xff] }
  0x33   : > { %1914 = vmatpush.xpose.msk.msra.mxu3 %vm478_vm0, %v358_v35  ;;  %v1071_v35 = vld [vmem:[%s2812_s4 + $0x60] sm:$0xff] }
  0x34   : > { %1819 = vmatpush.xpose.msk.msra.mxu0 %vm478_vm0, %v309_v37  ;;  %v1063_v37 = vld [vmem:[%s2812_s4 + $0x20] sm:$0xff] }
  0x35   : > { %1851 = vmatpush.xpose.msk.msra.mxu1 %vm478_vm0, %v325_v38  ;;  %v1480_v38 = vld [vmem:[%s2813_s5 + $0x8] sm:$0xff] }
  0x36   : > { %1883 = vmatpush.xpose.msk.msra.mxu2 %vm478_vm0, %v341_v39  ;;  %v1074_v39 = vld [vmem:[%s2812_s4 + $0x78] sm:$0xff] }
  0x37   : > { %1915 = vmatpush.xpose.msk.msra.mxu3 %vm478_vm0, %v357_v40  ;;  %400 = vperm.xlu0 %1950, %v382_v3   ;;  %v374_v40 = vld [vmem:[%s2809_s1 + $0x40] sm:$0xff] }
  0x38   : > { %1820 = vmatpush.xpose.msk.msra.mxu0 %vm478_vm0, %v308_v42  ;;  %420 = vperm.xlu2 %1952, %v386_v18   ;;  %v1483_v42 = vld [vmem:[%s2813_s5 + $0x20] sm:$0xff] }
  0x39   : > { %1852 = vmatpush.xpose.msk.msra.mxu1 %vm478_vm0, %v324_v43  ;;  %1077 = vperm.xlu1 %1951, %v1059_v22   ;;  %v1481_v43 = vld [vmem:[%s2813_s5 + $0x10] sm:$0xff] }
  0x3a   : > { %1884 = vmatpush.xpose.msk.msra.mxu2 %vm478_vm0, %v340_v44  ;;  %v375_v44 = vld [vmem:[%s2809_s1 + $0x48] sm:$0xff] }
  0x3b   : > { %1916 = vmatpush.xpose.msk.msra.mxu3 %vm478_vm0, %v356_v45  ;;  %v1069_v45 = vld [vmem:[%s2812_s4 + $0x50] sm:$0xff] }
  0x3c   : > { %1821 = vmatpush.xpose.msk.msra.mxu0 %vm478_vm0, %v307_v47  ;;  %v1484_v47 = vld [vmem:[%s2813_s5 + $0x28] sm:$0xff] }
  0x3d   : > { %1853 = vmatpush.xpose.msk.msra.mxu1 %vm478_vm0, %v323_v48  ;;  %v376_v48 = vld [vmem:[%s2809_s1 + $0x50] sm:$0xff] }
  0x3e   : > { %1885 = vmatpush.xpose.msk.msra.mxu2 %vm478_vm0, %v339_v49  ;;  %v1072_v49 = vld [vmem:[%s2812_s4 + $0x68] sm:$0xff] }
  0x3f   : > { %1917 = vmatpush.xpose.msk.msra.mxu3 %vm478_vm0, %v355_v50  ;;  %1087 = vperm.xlu0 %1950, %v1061_v20   ;;  %v1489_v50 = vld [vmem:[%s2813_s5 + $0x50] sm:$0xff] }
  0x40   : > { %1822 = vmatpush.xpose.msk.msra.mxu0 %vm478_vm0, %v306_v52  ;;  %405 = vperm.xlu2 %1952, %v383_v21   ;;  %v377_v52 = vld [vmem:[%s2809_s1 + $0x58] sm:$0xff] }
  0x41   : > { %1854 = vmatpush.xpose.msk.msra.mxu1 %vm478_vm0, %v322_v53  ;;  %1092 = vperm.xlu1 %1951, %v1062_v25   ;;  %v1479_v53 = vld [vmem:[%s2813_s5] sm:$0xff] }
  0x42   : > { %1886 = vmatpush.xpose.msk.msra.mxu2 %vm478_vm0, %v338_v54  ;;  %v1492_v54 = vld [vmem:[%s2813_s5 + $0x68] sm:$0xff] }
  0x43   : > { %1918 = vmatpush.xpose.msk.msra.mxu3 %vm478_vm0, %v354_v55  ;;  %v1490_v55 = vld [vmem:[%s2813_s5 + $0x58] sm:$0xff] }
  0x44   : > { %1823 = vmatpush.xpose.msk.msra.mxu0 %vm478_vm0, %v305_v57  ;;  %v1482_v57 = vld [vmem:[%s2813_s5 + $0x18] sm:$0xff] }
  0x45   : > { %1855 = vmatpush.xpose.msk.msra.mxu1 %vm478_vm0, %v321_v58  ;;  %v1723_v58 = vld [vmem:[#allocation2] sm:$0x1] }
  0x46   : > { %1887 = vmatpush.xpose.msk.msra.mxu2 %vm478_vm0, %v337_v59  ;;  %v1493_v59 = vld [vmem:[%s2813_s5 + $0x70] sm:$0xff] }
  0x47   : > { %1919 = vmatpush.xpose.msk.msra.mxu3 %vm478_vm0, %v353_v60  ;;  %1102 = vperm.xlu0 %1950, %v1064_v24   ;;  %v379_v60 = vld [vmem:[%s2809_s1 + $0x68] sm:$0xff] }
  0x48   : > { %1824 = vmatpush.xpose.msk.msra.mxu0 %vm478_vm0, %v304_v63  ;;  %1082 = vperm.xlu2 %1952, %v1060_v33   ;;  %v1488_v63 = vld [vmem:[%s2813_s5 + $0x48] sm:$0xff] }
  0x49   : > { %1856 = vmatpush.xpose.msk.msra.mxu1 %vm478_vm0, %v320_v0  ;;  %1107 = vperm.xlu1 %1951, %v1065_v28   ;;  %v381_v0 = vld [vmem:[%s2809_s1 + $0x78] sm:$0xff] }
  0x4a   : > { %1888 = vmatpush.xpose.msk.msra.mxu2 %vm478_vm0, %v336_v1  ;;  %v1491_v1 = vld [vmem:[%s2813_s5 + $0x60] sm:$0xff] }
  0x4b   : > { %1920 = vmatpush.xpose.msk.msra.mxu3 %vm478_vm0, %v352_v2 }
  0x4c   : > { %1825 = vmatpush.xpose.msk.msra.mxu0 %vm478_vm0, %v303_v4  ;;  %v1494_v4 = vld [vmem:[%s2813_s5 + $0x78] sm:$0xff] }
  0x4d   : > { %1857 = vmatpush.xpose.msk.msra.mxu1 %vm478_vm0, %v319_v5 }
  0x4e   : > { %1889 = vmatpush.xpose.msk.msra.mxu2 %vm478_vm0, %v335_v6 }
  0x4f   : > { %1921 = vmatpush.xpose.msk.msra.mxu3 %vm478_vm0, %v351_v7  ;;  %1117 = vperm.xlu0 %1950, %v1067_v27  }
  0x50   : > { %1826 = vmatpush.xpose.msk.msra.mxu0 %vm478_vm0, %v302_v10  ;;  %1097 = vperm.xlu2 %1952, %v1063_v37  }
  0x51   : > { %1858 = vmatpush.xpose.msk.msra.mxu1 %vm478_vm0, %v318_v11  ;;  %1122 = vperm.xlu1 %1951, %v1068_v31  }
  0x52   : > { %1890 = vmatpush.xpose.msk.msra.mxu2 %vm478_vm0, %v334_v12 }
  0x53   : > { %1922 = vmatpush.xpose.msk.msra.mxu3 %vm478_vm0, %v350_v13  ;;  %1827 = vmatmul.msk.f32.vlgmr.msra.gmra.mxu0 %vm478_vm0, %v366_v14 }
  0x54   : > { %1859 = vmatmul.msk.f32.vlgmr.msra.gmra.mxu1 %vm478_vm0, %v366_v14 }
  0x55   : > { %1891 = vmatmul.msk.f32.vlgmr.msra.gmra.mxu2 %vm478_vm0, %v366_v14 }
  0x56   : > { %1923 = vmatmul.msk.f32.vlgmr.msra.gmra.mxu3 %vm478_vm0, %v366_v14 }
  0x57   : > { %1132 = vperm.xlu0 %1950, %v1070_v30  }
  0x58   : > { %1112 = vperm.xlu2 %1952, %v1066_v41  }
  0x59   : > { %1137 = vperm.xlu1 %1951, %v1071_v35  }
  0x5b   : > { %1828 = vmatmul.msk.f32.gmra.mxu0 %vm478_vm0, %v367_v17 }
  0x5c   : > { %1860 = vmatmul.msk.f32.gmra.mxu1 %vm478_vm0, %v367_v17 }
  0x5d   : > { %1892 = vmatmul.msk.f32.gmra.mxu2 %vm478_vm0, %v367_v17 }
  0x5e   : > { %1924 = vmatmul.msk.f32.gmra.mxu3 %vm478_vm0, %v367_v17 }
  0x5f   : > { %1147 = vperm.xlu0 %1950, %v1073_v34  }
  0x60   : > { %1127 = vperm.xlu2 %1952, %v1069_v45  }
  0x61   : > { %1152 = vperm.xlu1 %1951, %v1074_v39  }
  0x63   : > { %1829 = vmatmul.msk.f32.gmra.mxu0 %vm478_vm0, %v368_v19 }
  0x64   : > { %1861 = vmatmul.msk.f32.gmra.mxu1 %vm478_vm0, %v368_v19 }
  0x65   : > { %1893 = vmatmul.msk.f32.gmra.mxu2 %vm478_vm0, %v368_v19 }
  0x66   : > { %1925 = vmatmul.msk.f32.gmra.mxu3 %vm478_vm0, %v368_v19 }
  0x67   : > { %1502 = vperm.xlu0 %1950, %v1480_v38  }
  0x68   : > { %1142 = vperm.xlu2 %1952, %v1072_v49  }
  0x69   : > { %1507 = vperm.xlu1 %1951, %v1481_v43  }
  0x6b   : > { %1830 = vmatmul.msk.f32.gmra.mxu0 %vm478_vm0, %v369_v23 }
  0x6c   : > { %1862 = vmatmul.msk.f32.gmra.mxu1 %vm478_vm0, %v369_v23 }
  0x6d   : > { %1894 = vmatmul.msk.f32.gmra.mxu2 %vm478_vm0, %v369_v23 }
  0x6e   : > { %1926 = vmatmul.msk.f32.gmra.mxu3 %vm478_vm0, %v369_v23 }
  0x6f   : > { %1517 = vperm.xlu0 %1950, %v1483_v42  }
  0x70   : > { %1497 = vperm.xlu2 %1952, %v1479_v53  }
  0x71   : > { %1522 = vperm.xlu1 %1951, %v1484_v47  }
  0x73   : > { %1831 = vmatmul.msk.f32.gmra.mxu0 %vm478_vm0, %v370_v26 }
  0x74   : > { %1863 = vmatmul.msk.f32.gmra.mxu1 %vm478_vm0, %v370_v26 }
  0x75   : > { %1895 = vmatmul.msk.f32.gmra.mxu2 %vm478_vm0, %v370_v26 }
  0x76   : > { %1927 = vmatmul.msk.f32.gmra.mxu3 %vm478_vm0, %v370_v26 }
  0x77   : > { %1532 = vperm.xlu0 %1950, %v1486_v46  }
  0x78   : > { %1512 = vperm.xlu2 %1952, %v1482_v57  }
  0x79   : > { %1537 = vperm.xlu1 %1951, %v1487_v51  }
  0x7b   : > { %1832 = vmatmul.msk.f32.gmra.mxu0 %vm478_vm0, %v371_v29 }
  0x7c   : > { %1864 = vmatmul.msk.f32.gmra.mxu1 %vm478_vm0, %v371_v29 }
  0x7d   : > { %1896 = vmatmul.msk.f32.gmra.mxu2 %vm478_vm0, %v371_v29 }
  0x7e   : > { %1928 = vmatmul.msk.f32.gmra.mxu3 %vm478_vm0, %v371_v29 }
  0x7f   : > { %1547 = vperm.xlu0 %1950, %v1489_v50  }
  0x80   : > { %1527 = vperm.xlu2 %1952, %v1485_v61  }
  0x81   : > { %1552 = vperm.xlu1 %1951, %v1490_v55   ;;  %v476_v53 = vpop.permute.xlu0 %475 }
  0x83   : > { %1833 = vmatmul.msk.f32.gmra.mxu0 %vm478_vm0, %v372_v32 }
  0x84   : > { %1865 = vmatmul.msk.f32.gmra.mxu1 %vm478_vm0, %v372_v32 }
  0x85   : > { %1897 = vmatmul.msk.f32.gmra.mxu2 %vm478_vm0, %v372_v32 }
  0x86   : > { %1929 = vmatmul.msk.f32.gmra.mxu3 %vm478_vm0, %v372_v32 }
  0x87   : > { %1562 = vperm.xlu0 %1950, %v1492_v54   ;;  %v466_v54 = vpop.permute.xlu1 %465 }
  0x88   : > { %1542 = vperm.xlu2 %1952, %v1488_v63  }
  0x89   : > { %1567 = vperm.xlu1 %1951, %v1493_v59   ;;  %v2492_v59 = vpop.permute.xlu2 %455 }
  0x8b   : > { %1834 = vmatmul.msk.f32.gmra.mxu0 %vm478_vm0, %v373_v36 }
  0x8c   : > { %1866 = vmatmul.msk.f32.gmra.mxu1 %vm478_vm0, %v373_v36 }
  0x8d   : > { %1898 = vmatmul.msk.f32.gmra.mxu2 %vm478_vm0, %v373_v36 }
  0x8e   : > { %1930 = vmatmul.msk.f32.gmra.mxu3 %vm478_vm0, %v373_v36 }
  0x8f   : > { %1726 = vperm.xlu0 %1950, %v1723_v58  }
  0x90   : > { %1557 = vperm.xlu2 %1952, %v1491_v1   ;;  %v461_v1 = vpop.permute.xlu1 %460 }
  0x93   : > { %1835 = vmatmul.msk.f32.gmra.mxu0 %vm478_vm0, %v374_v40 }
  0x94   : > { %1867 = vmatmul.msk.f32.gmra.mxu1 %vm478_vm0, %v374_v40 }
  0x95   : > { %1899 = vmatmul.msk.f32.gmra.mxu2 %vm478_vm0, %v374_v40 }
  0x96   : > { %1931 = vmatmul.msk.f32.gmra.mxu3 %vm478_vm0, %v374_v40 }
  0x98   : > { %1572 = vperm.xlu2 %1952, %v1494_v4   ;;  %v2494_v4 = vpop.permute.xlu2 %450 }
  0x9b   : > { %1836 = vmatmul.msk.f32.gmra.mxu0 %vm478_vm0, %v375_v44 }
  0x9c   : > { %1868 = vmatmul.msk.f32.gmra.mxu1 %vm478_vm0, %v375_v44 }
  0x9d   : > { %1900 = vmatmul.msk.f32.gmra.mxu2 %vm478_vm0, %v375_v44 }
  0x9e   : > { %1932 = vmatmul.msk.f32.gmra.mxu3 %vm478_vm0, %v375_v44 }
  0xa3   : > { %1837 = vmatmul.msk.f32.gmra.mxu0 %vm478_vm0, %v376_v48 }
  0xa4   : > { %1869 = vmatmul.msk.f32.gmra.mxu1 %vm478_vm0, %v376_v48 }
  0xa5   : > { %1901 = vmatmul.msk.f32.gmra.mxu2 %vm478_vm0, %v376_v48 }
  0xa6   : > { %1933 = vmatmul.msk.f32.gmra.mxu3 %vm478_vm0, %v376_v48 }
  0xab   : > { %1838 = vmatmul.msk.f32.gmra.mxu0 %vm478_vm0, %v377_v52 }
  0xac   : > { %1870 = vmatmul.msk.f32.gmra.mxu1 %vm478_vm0, %v377_v52 }
  0xad   : > { %1902 = vmatmul.msk.f32.gmra.mxu2 %vm478_vm0, %v377_v52 }
  0xae   : > { %1934 = vmatmul.msk.f32.gmra.mxu3 %vm478_vm0, %v377_v52 }
  0xb3   : > { %1839 = vmatmul.msk.f32.gmra.mxu0 %vm478_vm0, %v378_v56 }
  0xb4   : > { %1871 = vmatmul.msk.f32.gmra.mxu1 %vm478_vm0, %v378_v56 }
  0xb5   : > { %1903 = vmatmul.msk.f32.gmra.mxu2 %vm478_vm0, %v378_v56 }
  0xb6   : > { %1935 = vmatmul.msk.f32.gmra.mxu3 %vm478_vm0, %v378_v56 }
  0xbb   : > { %1840 = vmatmul.msk.f32.gmra.mxu0 %vm478_vm0, %v379_v60 }
  0xbc   : > { %1872 = vmatmul.msk.f32.gmra.mxu1 %vm478_vm0, %v379_v60 }
  0xbd   : > { %1904 = vmatmul.msk.f32.gmra.mxu2 %vm478_vm0, %v379_v60 }
  0xbe   : > { %1936 = vmatmul.msk.f32.gmra.mxu3 %vm478_vm0, %v379_v60  ;;  %v471_v60 = vpop.permute.xlu0 %470 }
  0xc3   : > { %1841 = vmatmul.msk.f32.gmra.mxu0 %vm478_vm0, %v380_v62 }
  0xc4   : > { %1873 = vmatmul.msk.f32.gmra.mxu1 %vm478_vm0, %v380_v62 }
  0xc5   : > { %1905 = vmatmul.msk.f32.gmra.mxu2 %vm478_vm0, %v380_v62 }
  0xc6   : > { %1937 = vmatmul.msk.f32.gmra.mxu3 %vm478_vm0, %v380_v62 }
  0xcb   : > { %1842 = vmatmul.msk.f32.gmra.mxu0 %vm478_vm0, %v381_v0 }
  0xcc   : > { %1874 = vmatmul.msk.f32.gmra.mxu1 %vm478_vm0, %v381_v0 }
  0xcd   : > { %1906 = vmatmul.msk.f32.gmra.mxu2 %vm478_vm0, %v381_v0 }
  0xce   : > { %1938 = vmatmul.msk.f32.gmra.mxu3 %vm478_vm0, %v381_v0 }
  0xd0   : > { %v2401_v2 = vpop.f32.mrf.mxu0 }
  0xd1   : > { %2816 = vst [vmem:[#allocation3_spill] sm:$0xff] %v2401_v2  ;;  %v2403_v3 = vpop.f32.mrf.mxu1 }
  0xd2   : > { %2817 = vst [vmem:[#allocation4_spill] sm:$0xff] %v2403_v3 }
  0xd8   : > { %v2408_v5 = vpop.f32.mrf.mxu2  ;;  %v2412_v7 = vpop.f32.mrf.mxu0 }
  0xd9   : > { %2818 = vst [vmem:[#allocation5_spill] sm:$0xff] %v2408_v5  ;;  %v2410_v6 = vpop.f32.mrf.mxu3  ;;  %v2414_v8 = vpop.f32.mrf.mxu1 }
  0xda   : > { %2819 = vst [vmem:[#allocation6_spill] sm:$0xff] %v2410_v6  ;;  %v2496_v6 = vpop.permute.xlu0 %445 }
  0xdb   : > { %2820 = vst [vmem:[#allocation7_spill] sm:$0xff] %v2412_v7  ;;  %v2498_v7 = vpop.permute.xlu1 %440 }
  0xdc   : > { %2821 = vst [vmem:[#allocation8_spill] sm:$0xff] %v2414_v8 }
  0xe0   : > { %v2416_v9 = vpop.f32.mrf.mxu2  ;;  %v2420_v11 = vpop.f32.mrf.mxu0 }
  0xe1   : > { %2822 = vst [vmem:[#allocation9_spill] sm:$0xff] %v2416_v9  ;;  %v2418_v10 = vpop.f32.mrf.mxu3  ;;  %v2422_v12 = vpop.f32.mrf.mxu1 }
  0xe2   : > { %2823 = vst [vmem:[#allocation10_spill] sm:$0xff] %v2418_v10 }
  0xe3   : > { %2824 = vst [vmem:[#allocation11_spill] sm:$0xff] %v2420_v11 }
  0xe4   : > { %2825 = vst [vmem:[#allocation12_spill] sm:$0xff] %v2422_v12 }
  0xe8   : > { %v2424_v13 = vpop.f32.mrf.mxu2  ;;  %v2428_v15 = vpop.f32.mrf.mxu0 }
  0xe9   : > { %2826 = vst [vmem:[#allocation13_spill] sm:$0xff] %v2424_v13  ;;  %v2426_v14 = vpop.f32.mrf.mxu3  ;;  %v2430_v16 = vpop.f32.mrf.mxu1 }
  0xea   : > { %2827 = vst [vmem:[#allocation14_spill] sm:$0xff] %v2426_v14 }
  0xf0   : > { %v2432_v17 = vpop.f32.mrf.mxu2  ;;  %v2436_v19 = vpop.f32.mrf.mxu0 }
  0xf1   : > { %2828 = vst [vmem:[#allocation15_spill] sm:$0xff] %v2432_v17  ;;  %v2434_v18 = vpop.f32.mrf.mxu3  ;;  %v2438_v20 = vpop.f32.mrf.mxu1 }
  0xf2   : > { %2829 = vst [vmem:[#allocation16_spill] sm:$0xff] %v2434_v18 }
  0xf8   : > { %v2440_v21 = vpop.f32.mrf.mxu2  ;;  %v2444_v23 = vpop.f32.mrf.mxu0 }
  0xf9   : > { %2830 = vst [vmem:[#allocation17_spill] sm:$0xff] %v2440_v21  ;;  %v2442_v22 = vpop.f32.mrf.mxu3  ;;  %v2446_v24 = vpop.f32.mrf.mxu1 }
  0xfa   : > { %2831 = vst [vmem:[#allocation18_spill] sm:$0xff] %v2442_v22 }
 0x100   : > { %v2448_v25 = vpop.f32.mrf.mxu2  ;;  %v2452_v27 = vpop.f32.mrf.mxu0 }
 0x101   : > { %2832 = vst [vmem:[#allocation19_spill] sm:$0xff] %v2448_v25  ;;  %v2450_v26 = vpop.f32.mrf.mxu3  ;;  %v2454_v28 = vpop.f32.mrf.mxu1 }
 0x102   : > { %2833 = vst [vmem:[#allocation20_spill] sm:$0xff] %v2450_v26 }
 0x108   : > { %v2456_v29 = vpop.f32.mrf.mxu2  ;;  %v2460_v31 = vpop.f32.mrf.mxu0 }
 0x109   : > { %2834 = vst [vmem:[#allocation21_spill] sm:$0xff] %v2456_v29  ;;  %v2458_v30 = vpop.f32.mrf.mxu3  ;;  %v2462_v32 = vpop.f32.mrf.mxu1 }
 0x10a   : > { %2835 = vst [vmem:[#allocation22_spill] sm:$0xff] %v2458_v30  ;;  %v2500_v30 = vpop.permute.xlu2 %435 }
 0x110   : > { %v2464_v33 = vpop.f32.mrf.mxu2  ;;  %v2468_v35 = vpop.f32.mrf.mxu0 }
 0x111   : > { %v2466_v34 = vpop.f32.mrf.mxu3  ;;  %v2470_v36 = vpop.f32.mrf.mxu1 }
 0x118   : > { %v2472_v37 = vpop.f32.mrf.mxu2  ;;  %v2476_v39 = vpop.f32.mrf.mxu0 }
 0x119   : > { %v2474_v38 = vpop.f32.mrf.mxu3  ;;  %v2478_v40 = vpop.f32.mrf.mxu1 }
 0x120   : > { %v2480_v41 = vpop.f32.mrf.mxu2  ;;  %v766_v43 = vpop.f32.mrf.mxu0 }
 0x121   : > { %v2482_v42 = vpop.f32.mrf.mxu3  ;;  %v831_v44 = vpop.f32.mrf.mxu1 }
 0x128   : > { %v2484_v45 = vpop.f32.mrf.mxu2  ;;  %v769_v47 = vpop.f32.mrf.mxu0 }
 0x129   : > { %v2486_v46 = vpop.f32.mrf.mxu3  ;;  %v834_v48 = vpop.f32.mrf.mxu1  ;;  %v770_v29 = vadd.f32 %v769_v47, %v2492_v59 }
 0x130   : > { %v2488_v49 = vpop.f32.mrf.mxu2  ;;  %v772_v51 = vpop.f32.mrf.mxu0 }
 0x131   : > { %v2490_v50 = vpop.f32.mrf.mxu3  ;;  %v837_v52 = vpop.f32.mrf.mxu1  ;;  %v773_v26 = vadd.f32 %v772_v51, %v461_v1 }
 0x132   : > { %v838_v25 = vadd.f32 %v837_v52, %v461_v1 }
 0x133   : > { %v1027_v52 = vmax.f32 %v773_v26, 0.0 }
 0x134   : > { %v1028_v47 = vmax.f32 %v838_v25, 0.0 }
 0x138   : > { %v902_v55 = vpop.f32.mrf.mxu2  ;;  %v775_v57 = vpop.f32.mrf.mxu0 }
 0x139   : > { %v967_v56 = vpop.f32.mrf.mxu3  ;;  %v840_v58 = vpop.f32.mrf.mxu1  ;;  %v776_v2 = vadd.f32 %v775_v57, %v466_v54 }
 0x13a   : > { %v841_v22 = vadd.f32 %v840_v58, %v466_v54 }
 0x140   : > { %v905_v61 = vpop.f32.mrf.mxu2  ;;  %v778_v63 = vpop.f32.mrf.mxu0 }
 0x141   : > { %v970_v62 = vpop.f32.mrf.mxu3  ;;  %v843_v0 = vpop.f32.mrf.mxu1  ;;  %v779_v13 = vadd.f32 %v778_v63, %v471_v60  ;;  %v835_v63 = vadd.f32 %v834_v48, %v2492_v59 }
 0x142   : > { %v844_v18 = vadd.f32 %v843_v0, %v471_v60 }
 0x143   : > { %v1035_v12 = vmax.f32 %v779_v13, 0.0 }
 0x144   : > { %v1036_v11 = vmax.f32 %v844_v18, 0.0 }
 0x148   : > { %v908_v5 = vpop.f32.mrf.mxu2  ;;  %v781_v9 = vpop.f32.mrf.mxu0 }
 0x149   : > { %v973_v10 = vpop.f32.mrf.mxu3  ;;  %v846_v14 = vpop.f32.mrf.mxu1  ;;  %v782_v17 = vadd.f32 %v781_v9, %v476_v53  ;;  %v1031_v9 = vmax.f32 %v776_v2, 0.0  ;;  %v906_v2 = vadd.f32 %v905_v61, %v466_v54 }
 0x14a   : > { %v847_v3 = vadd.f32 %v846_v14, %v476_v53  ;;  %v1032_v14 = vmax.f32 %v841_v22, 0.0  ;;  %v974_v51 = vadd.f32 %v973_v10, %v471_v60  ;;  %v971_v22 = vadd.f32 %v970_v62, %v466_v54 }
 0x14b   : > { %v1039_v21 = vmax.f32 %v782_v17, 0.0  ;;  %v909_v17 = vadd.f32 %v908_v5, %v471_v60  ;;  %v829_v5 = vadd.f32 %v2478_v40, %v2496_v6  ;;  %v1023_v10 = vmax.f32 %v770_v29, 0.0  ;;  %v2516_v29 = vpop.permute.xlu1 %425 }
 0x14c   : > { %v1040_v8 = vmax.f32 %v847_v3, 0.0  ;;  %v2504_v3 = vpop.permute.xlu0 %430  ;;  %v1038_v25 = vmax.f32 %v974_v51, 0.0  ;;  %v826_v54 = vadd.f32 %v2470_v36, %v2498_v7  ;;  %v900_v40 = vadd.f32 %v2488_v49, %v2492_v59 }
 0x14d   : > { %1155 = vmatpush.msrb.mxu0 %v1039_v21  ;;  %v832_v21 = vadd.f32 %v831_v44, %v2494_v4  ;;  %v968_v44 = vadd.f32 %v967_v56, %v461_v1  ;;  %v1037_v26 = vmax.f32 %v909_v17, 0.0  ;;  %v1033_v56 = vmax.f32 %v906_v2, 0.0 }
 0x14e   : > { %1220 = vmatpush.msrb.mxu1 %v1040_v8  ;;  %v767_v8 = vadd.f32 %v766_v43, %v2494_v4  ;;  %v903_v43 = vadd.f32 %v902_v55, %v461_v1  ;;  %v965_v55 = vadd.f32 %v2490_v50, %v2492_v59  ;;  %v1034_v61 = vmax.f32 %v971_v22, 0.0 }
 0x14f   : > { %1156 = vmatpush.msrb.mxu0 %v1035_v12  ;;  %v1024_v12 = vmax.f32 %v835_v63, 0.0  ;;  %v1020_v60 = vmax.f32 %v832_v21, 0.0  ;;  %v823_v36 = vadd.f32 %v2462_v32, %v2500_v30  ;;  %v1016_v1 = vmax.f32 %v829_v5, 0.0  ;;  %v2526_v63 = vpop.permute.xlu2 %420 }
 0x150   : > { %v911_v57 = vpop.f32.mrf.mxu2  ;;  %1221 = vmatpush.msrb.mxu1 %v1036_v11  ;;  %v764_v11 = vadd.f32 %v2476_v39, %v2496_v6  ;;  %v1019_v39 = vmax.f32 %v767_v8, 0.0  ;;  %v897_v49 = vadd.f32 %v2484_v45, %v2494_v4  ;;  %v962_v50 = vadd.f32 %v2486_v46, %v2494_v4 }
 0x151   : > { %v976_v58 = vpop.f32.mrf.mxu3  ;;  %v912_v13 = vadd.f32 %v911_v57, %v476_v53  ;;  %1157 = vmatpush.msrb.mxu0 %v1031_v9  ;;  %v1029_v59 = vmax.f32 %v903_v43, 0.0  ;;  %v1030_v9 = vmax.f32 %v968_v44, 0.0  ;;  %v820_v32 = vadd.f32 %v2454_v28, %v2504_v3 }
 0x152   : > { %v977_v18 = vadd.f32 %v976_v58, %v476_v53  ;;  %1222 = vmatpush.msrb.mxu1 %v1032_v14  ;;  %v761_v53 = vadd.f32 %v2468_v35, %v2498_v7  ;;  %v758_v35 = vadd.f32 %v2460_v31, %v2500_v30  ;;  %v1015_v62 = vmax.f32 %v764_v11, 0.0 }
 0x153   : > { %v1041_v48 = vmax.f32 %v912_v13, 0.0  ;;  %1158 = vmatpush.msrb.mxu0 %v1027_v52  ;;  %v755_v31 = vadd.f32 %v2452_v27, %v2504_v3  ;;  %v1012_v57 = vmax.f32 %v826_v54, 0.0  ;;  %v894_v45 = vadd.f32 %v2480_v41, %v2496_v6  ;;  %v411_v22 = vpop.permute.xlu1 %410 }
 0x154   : > { %v1042_v0 = vmax.f32 %v977_v18, 0.0  ;;  %1223 = vmatpush.msrb.mxu1 %v1028_v47  ;;  %v1011_v14 = vmax.f32 %v761_v53, 0.0  ;;  %v2536_v58 = vpop.permute.xlu0 %415  ;;  %v959_v46 = vadd.f32 %v2482_v42, %v2496_v6  ;;  %v1025_v4 = vmax.f32 %v900_v40, 0.0  ;;  %v2841_v53 = vld [vmem:[#allocation20_spill] sm:$0xff] }
 0x155   : > { %1285 = vmatpush.msrb.mxu2 %v1041_v48  ;;  %1159 = vmatpush.msrb.mxu0 %v1023_v10  ;;  %v1026_v17 = vmax.f32 %v965_v55, 0.0  ;;  %v752_v27 = vadd.f32 %v2444_v23, %v2516_v29  ;;  %v817_v28 = vadd.f32 %v2446_v24, %v2516_v29  ;;  %v1007_v51 = vmax.f32 %v758_v35, 0.0  ;;  %v2842_v55 = vld [vmem:[#allocation7_spill] sm:$0xff] }
 0x156   : > { %1350 = vmatpush.msrb.mxu3 %v1042_v0  ;;  %1224 = vmatpush.msrb.mxu1 %v1024_v12  ;;  %v1008_v13 = vmax.f32 %v823_v36, 0.0  ;;  %v891_v41 = vadd.f32 %v2472_v37, %v2498_v7  ;;  %v956_v6 = vadd.f32 %v2474_v38, %v2498_v7  ;;  %v1021_v42 = vmax.f32 %v897_v49, 0.0  ;;  %v2839_v12 = vld [vmem:[#allocation12_spill] sm:$0xff]  ;;  %v2845_v49 = vld [vmem:[#allocation18_spill] sm:$0xff] }
 0x157   : > { %1286 = vmatpush.msrb.mxu2 %v1037_v26  ;;  %1160 = vmatpush.msrb.mxu0 %v1019_v39  ;;  %v1022_v18 = vmax.f32 %v962_v50, 0.0  ;;  %v749_v23 = vadd.f32 %v2436_v19, %v2526_v63  ;;  %v814_v24 = vadd.f32 %v2438_v20, %v2526_v63  ;;  %v1003_v8 = vmax.f32 %v755_v31, 0.0  ;;  %v406_v44 = vpop.permute.xlu2 %405  ;;  %v2840_v26 = vld [vmem:[#allocation19_spill] sm:$0xff] }
 0x158   : > { %1351 = vmatpush.msrb.mxu3 %v1038_v25  ;;  %1225 = vmatpush.msrb.mxu1 %v1020_v60  ;;  %v1004_v21 = vmax.f32 %v820_v32, 0.0  ;;  %v888_v37 = vadd.f32 %v2464_v33, %v2500_v30  ;;  %v953_v7 = vadd.f32 %v2466_v34, %v2500_v30  ;;  %v1017_v38 = vmax.f32 %v894_v45, 0.0  ;;  %v2836_v33 = vld [vmem:[#allocation21_spill] sm:$0xff]  ;;  %v2837_v30 = vld [vmem:[#allocation22_spill] sm:$0xff]  ;;  %v2846_v32 = vld [vmem:[#allocation3_spill] sm:$0xff] }
 0x159   : > { %1287 = vmatpush.msrb.mxu2 %v1033_v56  ;;  %1161 = vmatpush.msrb.mxu0 %v1015_v62  ;;  %v1018_v52 = vmax.f32 %v959_v46, 0.0  ;;  %v746_v19 = vadd.f32 %v2428_v15, %v2536_v58  ;;  %v811_v20 = vadd.f32 %v2430_v16, %v2536_v58  ;;  %v999_v47 = vmax.f32 %v752_v27, 0.0  ;;  %v2838_v16 = vld [vmem:[#allocation11_spill] sm:$0xff]  ;;  %v2844_v62 = vld [vmem:[#allocation17_spill] sm:$0xff] }
 0x15a   : > { %1352 = vmatpush.msrb.mxu3 %v1034_v61  ;;  %1226 = vmatpush.msrb.mxu1 %v1016_v1  ;;  %v1000_v2 = vmax.f32 %v817_v28, 0.0  ;;  %v885_v48 = vadd.f32 %v2836_v33, %v2504_v3  ;;  %v950_v34 = vadd.f32 %v2837_v30, %v2504_v3  ;;  %v1013_v0 = vmax.f32 %v891_v41, 0.0  ;;  %v2843_v61 = vld [vmem:[#allocation8_spill] sm:$0xff]  ;;  %v2848_v46 = vld [vmem:[#allocation15_spill] sm:$0xff]  ;;  %v2850_v41 = vld [vmem:[#allocation13_spill] sm:$0xff] }
 0x15b   : > { %1288 = vmatpush.msrb.mxu2 %v1029_v59  ;;  %1162 = vmatpush.msrb.mxu0 %v1011_v14  ;;  %v1014_v11 = vmax.f32 %v956_v6, 0.0  ;;  %v995_v15 = vmax.f32 %v749_v23, 0.0  ;;  %v996_v5 = vmax.f32 %v814_v24, 0.0  ;;  %v743_v10 = vadd.f32 %v2838_v16, %v411_v22  ;;  %v1045_v16 = vld [vmem:[%s2811_s3 + $0x10] sm:$0xff] }
 0x15c   : > { %1353 = vmatpush.msrb.mxu3 %v1030_v9  ;;  %1227 = vmatpush.msrb.mxu1 %v1012_v57  ;;  %v808_v43 = vadd.f32 %v2839_v12, %v411_v22  ;;  %v882_v25 = vadd.f32 %v2840_v26, %v2516_v29  ;;  %v947_v54 = vadd.f32 %v2841_v53, %v2516_v29  ;;  %v1009_v3 = vmax.f32 %v888_v37, 0.0  ;;  %v401_v36 = vpop.permute.xlu0 %400  ;;  %v2847_v57 = vld [vmem:[#allocation4_spill] sm:$0xff]  ;;  %v1047_v12 = vld [vmem:[%s2811_s3 + $0x20] sm:$0xff]  ;;  %v1050_v26 = vld [vmem:[%s2811_s3 + $0x38] sm:$0xff] }
 0x15d   : > { %1289 = vmatpush.msrb.mxu2 %v1025_v4  ;;  %1163 = vmatpush.msrb.mxu0 %v1007_v51  ;;  %v1010_v39 = vmax.f32 %v953_v7, 0.0  ;;  %v991_v60 = vmax.f32 %v746_v19, 0.0  ;;  %v992_v40 = vmax.f32 %v811_v20, 0.0  ;;  %v740_v56 = vadd.f32 %v2842_v55, %v406_v44  ;;  %v2853_v7 = vld [vmem:[#allocation10_spill] sm:$0xff]  ;;  %v1052_v53 = vld [vmem:[%s2811_s3 + $0x48] sm:$0xff] }
 0x15e   : > { %1354 = vmatpush.msrb.mxu3 %v1026_v17  ;;  %1228 = vmatpush.msrb.mxu1 %v1008_v13  ;;  %v805_v35 = vadd.f32 %v2843_v61, %v406_v44  ;;  %v879_v1 = vadd.f32 %v2844_v62, %v2526_v63  ;;  %v944_v50 = vadd.f32 %v2845_v49, %v2526_v63  ;;  %v1005_v29 = vmax.f32 %v885_v48, 0.0  ;;  %v2849_v17 = vld [vmem:[#allocation16_spill] sm:$0xff]  ;;  %v1043_v20 = vld [vmem:[%s2811_s3] sm:$0xff] }
 0x15f   : > { %1290 = vmatpush.msrb.mxu2 %v1021_v42  ;;  %1164 = vmatpush.msrb.mxu0 %v1003_v8  ;;  %v1006_v59 = vmax.f32 %v950_v34, 0.0  ;;  %v987_v9 = vmax.f32 %v743_v10, 0.0  ;;  %v988_v31 = vmax.f32 %v808_v43, 0.0  ;;  %v737_v14 = vadd.f32 %v2846_v32, %v401_v36  ;;  %v2851_v42 = vld [vmem:[#allocation14_spill] sm:$0xff]  ;;  %v1048_v43 = vld [vmem:[%s2811_s3 + $0x28] sm:$0xff] }
 0x160   : > { %1355 = vmatpush.msrb.mxu3 %v1022_v18  ;;  %1229 = vmatpush.msrb.mxu1 %v1004_v21  ;;  %v802_v45 = vadd.f32 %v2847_v57, %v401_v36  ;;  %v876_v4 = vadd.f32 %v2848_v46, %v2536_v58  ;;  %v941_v27 = vadd.f32 %v2849_v17, %v2536_v58  ;;  %v1001_v63 = vmax.f32 %v882_v25, 0.0  ;;  %v2852_v21 = vld [vmem:[#allocation9_spill] sm:$0xff]  ;;  %v1051_v25 = vld [vmem:[%s2811_s3 + $0x40] sm:$0xff] }
 0x161   : > { %1291 = vmatpush.msrb.mxu2 %v1017_v38  ;;  %1165 = vmatpush.msrb.mxu0 %v999_v47  ;;  %v1002_v28 = vmax.f32 %v947_v54, 0.0  ;;  %v983_v51 = vmax.f32 %v740_v56, 0.0  ;;  %v984_v13 = vmax.f32 %v805_v35, 0.0  ;;  %v873_v6 = vadd.f32 %v2850_v41, %v411_v22  ;;  %v2854_v47 = vld [vmem:[#allocation5_spill] sm:$0xff]  ;;  %v1055_v55 = vld [vmem:[%s2811_s3 + $0x60] sm:$0xff] }
 0x162   : > { %1356 = vmatpush.msrb.mxu3 %v1018_v52  ;;  %1230 = vmatpush.msrb.mxu1 %v1000_v2  ;;  %v938_v18 = vadd.f32 %v2851_v42, %v411_v22  ;;  %v997_v23 = vmax.f32 %v879_v1, 0.0  ;;  %v998_v24 = vmax.f32 %v944_v50, 0.0  ;;  %v979_v8 = vmax.f32 %v737_v14, 0.0  ;;  %v2855_v22 = vld [vmem:[#allocation6_spill] sm:$0xff]  ;;  %v1053_v54 = vld [vmem:[%s2811_s3 + $0x50] sm:$0xff] }
 0x163   : > { %1292 = vmatpush.msrb.mxu2 %v1013_v0  ;;  %1166 = vmatpush.msrb.mxu0 %v995_v15  ;;  %v980_v58 = vmax.f32 %v802_v45, 0.0  ;;  %v870_v37 = vadd.f32 %v2852_v21, %v406_v44  ;;  %v935_v38 = vadd.f32 %v2853_v7, %v406_v44  ;;  %v993_v52 = vmax.f32 %v876_v4, 0.0  ;;  %v1046_v10 = vld [vmem:[%s2811_s3 + $0x18] sm:$0xff]  ;;  %v1049_v44 = vld [vmem:[%s2811_s3 + $0x30] sm:$0xff] }
 0x164   : > { %1357 = vmatpush.msrb.mxu3 %v1014_v11  ;;  %1231 = vmatpush.msrb.mxu1 %v996_v5  ;;  %v994_v19 = vmax.f32 %v941_v27, 0.0  ;;  %v867_v2 = vadd.f32 %v2854_v47, %v401_v36  ;;  %v932_v33 = vadd.f32 %v2855_v22, %v401_v36  ;;  %v989_v48 = vmax.f32 %v873_v6, 0.0  ;;  %v1044_v5 = vld [vmem:[%s2811_s3 + $0x8] sm:$0xff]  ;;  %v1057_v50 = vld [vmem:[%s2811_s3 + $0x70] sm:$0xff] }
 0x165   : > { %1293 = vmatpush.msrb.mxu2 %v1009_v3  ;;  %1167 = vmatpush.msrb.mxu0 %v991_v60  ;;  %v990_v30 = vmax.f32 %v938_v18, 0.0  ;;  %v985_v34 = vmax.f32 %v870_v37, 0.0  ;;  %v986_v0 = vmax.f32 %v935_v38, 0.0  ;;  %v2623_v3 = vpop.permute.xlu1 %1077  ;;  %v2628_v60 = vpop.permute.xlu0 %1087  ;;  %v1056_v36 = vld [vmem:[%s2811_s3 + $0x68] sm:$0xff] }
 0x166   : > { %1358 = vmatpush.msrb.mxu3 %v1010_v39  ;;  %1232 = vmatpush.msrb.mxu1 %v992_v40  ;;  %v981_v11 = vmax.f32 %v867_v2, 0.0  ;;  %v982_v15 = vmax.f32 %v932_v33, 0.0  ;;  %v1054_v39 = vld [vmem:[%s2811_s3 + $0x58] sm:$0xff]  ;;  %v2630_v40 = vpop.permute.xlu2 %1082 }
 0x167   : > { %1294 = vmatpush.msrb.mxu2 %v1005_v29  ;;  %1168 = vmatpush.msrb.mxu0 %v987_v9 }
 0x168   : > { %1359 = vmatpush.msrb.mxu3 %v1006_v59  ;;  %1233 = vmatpush.msrb.mxu1 %v988_v31  ;;  %v1058_v31 = vld [vmem:[%s2811_s3 + $0x78] sm:$0xff] }
 0x169   : > { %1295 = vmatpush.msrb.mxu2 %v1001_v63  ;;  %1169 = vmatpush.msrb.mxu0 %v983_v51 }
 0x16a   : > { %1360 = vmatpush.msrb.mxu3 %v1002_v28  ;;  %1234 = vmatpush.msrb.mxu1 %v984_v13 }
 0x16b   : > { %1296 = vmatpush.msrb.mxu2 %v997_v23  ;;  %1170 = vmatpush.msrb.mxu0 %v979_v8 }
 0x16c   : > { %1361 = vmatpush.msrb.mxu3 %v998_v24  ;;  %1235 = vmatpush.msrb.mxu1 %v980_v58 }
 0x16d   : > { %1297 = vmatpush.msrb.mxu2 %v993_v52  ;;  %1171 = vmatmul.f32.vlgmr.msrb.gmra.mxu0 %v1043_v20  ;;  %v2635_v56 = vpop.permute.xlu1 %1092  ;;  %v2637_v61 = vpop.permute.xlu0 %1102 }
 0x16e   : > { %1362 = vmatpush.msrb.mxu3 %v994_v19  ;;  %1236 = vmatmul.f32.vlgmr.msrb.gmra.mxu1 %v1043_v20  ;;  %v2639_v35 = vpop.permute.xlu2 %1097 }
 0x16f   : > { %1298 = vmatpush.msrb.mxu2 %v989_v48 }
 0x170   : > { %1363 = vmatpush.msrb.mxu3 %v990_v30 }
 0x171   : > { %1299 = vmatpush.msrb.mxu2 %v985_v34 }
 0x172   : > { %1364 = vmatpush.msrb.mxu3 %v986_v0 }
 0x173   : > { %1300 = vmatpush.msrb.mxu2 %v981_v11 }
 0x174   : > { %1365 = vmatpush.msrb.mxu3 %v982_v15  ;;  %1301 = vmatmul.f32.vlgmr.msrb.gmra.mxu2 %v1043_v20 }
 0x175   : > { %1366 = vmatmul.f32.vlgmr.msrb.gmra.mxu3 %v1043_v20  ;;  %1174 = vmatmul.f32.gmra.mxu0 %v1044_v5  ;;  %v2644_v62 = vpop.permute.xlu1 %1107  ;;  %v2646_v1 = vpop.permute.xlu0 %1117 }
 0x176   : > { %1239 = vmatmul.f32.gmra.mxu1 %v1044_v5  ;;  %v2648_v49 = vpop.permute.xlu2 %1112 }
 0x17c   : > { %1304 = vmatmul.f32.gmra.mxu2 %v1044_v5 }
 0x17d   : > { %1369 = vmatmul.f32.gmra.mxu3 %v1044_v5  ;;  %1177 = vmatmul.f32.gmra.mxu0 %v1045_v16  ;;  %v2653_v29 = vpop.permute.xlu1 %1122  ;;  %v2655_v59 = vpop.permute.xlu0 %1132 }
 0x17e   : > { %1242 = vmatmul.f32.gmra.mxu1 %v1045_v16  ;;  %v2657_v9 = vpop.permute.xlu2 %1127 }
 0x184   : > { %1307 = vmatmul.f32.gmra.mxu2 %v1045_v16 }
 0x185   : > { %1372 = vmatmul.f32.gmra.mxu3 %v1045_v16  ;;  %1180 = vmatmul.f32.gmra.mxu0 %v1046_v10  ;;  %v2662_v32 = vpop.permute.xlu1 %1137  ;;  %v2664_v45 = vpop.permute.xlu0 %1147 }
 0x186   : > { %1245 = vmatmul.f32.gmra.mxu1 %v1046_v10  ;;  %v2666_v46 = vpop.permute.xlu2 %1142 }
 0x18c   : > { %1310 = vmatmul.f32.gmra.mxu2 %v1046_v10 }
 0x18d   : > { %1375 = vmatmul.f32.gmra.mxu3 %v1046_v10  ;;  %1183 = vmatmul.f32.gmra.mxu0 %v1047_v12  ;;  %v2670_v28 = vpop.permute.xlu1 %1152  ;;  %v1503_v42 = vpop.permute.xlu0 %1502 }
 0x18e   : > { %1248 = vmatmul.f32.gmra.mxu1 %v1047_v12  ;;  %v1498_v18 = vpop.permute.xlu2 %1497 }
 0x194   : > { %1313 = vmatmul.f32.gmra.mxu2 %v1047_v12 }
 0x195   : > { %1378 = vmatmul.f32.gmra.mxu3 %v1047_v12  ;;  %1186 = vmatmul.f32.gmra.mxu0 %v1048_v43  ;;  %v1508_v30 = vpop.permute.xlu1 %1507 }
 0x196   : > { %1251 = vmatmul.f32.gmra.mxu1 %v1048_v43 }
 0x19c   : > { %1316 = vmatmul.f32.gmra.mxu2 %v1048_v43 }
 0x19d   : > { %1381 = vmatmul.f32.gmra.mxu3 %v1048_v43  ;;  %1189 = vmatmul.f32.gmra.mxu0 %v1049_v44 }
 0x19e   : > { %1254 = vmatmul.f32.gmra.mxu1 %v1049_v44 }
 0x1a4   : > { %1319 = vmatmul.f32.gmra.mxu2 %v1049_v44 }
 0x1a5   : > { %1384 = vmatmul.f32.gmra.mxu3 %v1049_v44  ;;  %1192 = vmatmul.f32.gmra.mxu0 %v1050_v26 }
 0x1a6   : > { %1257 = vmatmul.f32.gmra.mxu1 %v1050_v26 }
 0x1ac   : > { %1322 = vmatmul.f32.gmra.mxu2 %v1050_v26 }
 0x1ad   : > { %1387 = vmatmul.f32.gmra.mxu3 %v1050_v26  ;;  %1195 = vmatmul.f32.gmra.mxu0 %v1051_v25 }
 0x1ae   : > { %1260 = vmatmul.f32.gmra.mxu1 %v1051_v25 }
 0x1b4   : > { %1325 = vmatmul.f32.gmra.mxu2 %v1051_v25 }
 0x1b5   : > { %1390 = vmatmul.f32.gmra.mxu3 %v1051_v25  ;;  %1198 = vmatmul.f32.gmra.mxu0 %v1052_v53 }
 0x1b6   : > { %1263 = vmatmul.f32.gmra.mxu1 %v1052_v53 }
 0x1bc   : > { %1328 = vmatmul.f32.gmra.mxu2 %v1052_v53 }
 0x1bd   : > { %1393 = vmatmul.f32.gmra.mxu3 %v1052_v53  ;;  %1201 = vmatmul.f32.gmra.mxu0 %v1053_v54 }
 0x1be   : > { %1266 = vmatmul.f32.gmra.mxu1 %v1053_v54 }
 0x1c4   : > { %1331 = vmatmul.f32.gmra.mxu2 %v1053_v54 }
 0x1c5   : > { %1396 = vmatmul.f32.gmra.mxu3 %v1053_v54  ;;  %1204 = vmatmul.f32.gmra.mxu0 %v1054_v39 }
 0x1c6   : > { %1269 = vmatmul.f32.gmra.mxu1 %v1054_v39 }
 0x1cc   : > { %1334 = vmatmul.f32.gmra.mxu2 %v1054_v39 }
 0x1cd   : > { %1399 = vmatmul.f32.gmra.mxu3 %v1054_v39  ;;  %1207 = vmatmul.f32.gmra.mxu0 %v1055_v55 }
 0x1ce   : > { %1272 = vmatmul.f32.gmra.mxu1 %v1055_v55 }
 0x1d4   : > { %1337 = vmatmul.f32.gmra.mxu2 %v1055_v55 }
 0x1d5   : > { %1402 = vmatmul.f32.gmra.mxu3 %v1055_v55  ;;  %1210 = vmatmul.f32.gmra.mxu0 %v1056_v36 }
 0x1d6   : > { %1275 = vmatmul.f32.gmra.mxu1 %v1056_v36 }
 0x1dc   : > { %1340 = vmatmul.f32.gmra.mxu2 %v1056_v36 }
 0x1dd   : > { %1405 = vmatmul.f32.gmra.mxu3 %v1056_v36  ;;  %1213 = vmatmul.f32.gmra.mxu0 %v1057_v50 }
 0x1de   : > { %1278 = vmatmul.f32.gmra.mxu1 %v1057_v50 }
 0x1e4   : > { %1343 = vmatmul.f32.gmra.mxu2 %v1057_v50 }
 0x1e5   : > { %1408 = vmatmul.f32.gmra.mxu3 %v1057_v50  ;;  %1216 = vmatmul.f32.gmra.mxu0 %v1058_v31 }
 0x1e6   : > { %1281 = vmatmul.f32.gmra.mxu1 %v1058_v31 }
 0x1ea   : > { %v1172_v14 = vpop.f32.mrf.mxu0 }
 0x1eb   : > { %v1237_v57 = vpop.f32.mrf.mxu1  ;;  %v1173_v4 = vadd.f32 %v1172_v14, %v2623_v3 }
 0x1ec   : > { %1346 = vmatmul.f32.gmra.mxu2 %v1058_v31  ;;  %v1238_v17 = vadd.f32 %v1237_v57, %v2623_v3 }
 0x1ed   : > { %1411 = vmatmul.f32.gmra.mxu3 %v1058_v31  ;;  %v1415_v51 = vmax.f32 %v1173_v4, 0.0  ;;  %v1513_v4 = vpop.permute.xlu2 %1512 }
 0x1ee   : > { %v1416_v13 = vmax.f32 %v1238_v17, 0.0 }
 0x1ef   : > { %v1575_v21 = vmul.f32 %v1498_v18, %v1415_v51 }
 0x1f0   : > { %v1576_v37 = vmul.f32 %v1498_v18, %v1416_v13 }
 0x1f2   : > { %v1175_v27 = vpop.f32.mrf.mxu0 }
 0x1f3   : > { %v1240_v63 = vpop.f32.mrf.mxu1  ;;  %v1176_v41 = vadd.f32 %v1175_v27, %v2630_v40 }
 0x1f4   : > { %v1241_v6 = vadd.f32 %v1240_v63, %v2630_v40 }
 0x1f5   : > { %v1419_v23 = vmax.f32 %v1176_v41, 0.0 }
 0x1f6   : > { %v1420_v24 = vmax.f32 %v1241_v6, 0.0 }
 0x1f7   : > { %v1302_v8 = vpop.f32.mrf.mxu2  ;;  %v1579_v7 = vmul.f32 %v1503_v42, %v1419_v23 }
 0x1f8   : > { %v1367_v58 = vpop.f32.mrf.mxu3  ;;  %v1580_v38 = vmul.f32 %v1503_v42, %v1420_v24  ;;  %v1303_v20 = vadd.f32 %v1302_v8, %v2623_v3 }
 0x1f9   : > { %v1639_v52 = vadd.f32 %v1579_v7, %v1575_v21  ;;  %v1368_v47 = vadd.f32 %v1367_v58, %v2623_v3 }
 0x1fa   : > { %v1660_v19 = vadd.f32 %v1580_v38, %v1576_v37  ;;  %v1178_v2 = vpop.f32.mrf.mxu0  ;;  %v1417_v11 = vmax.f32 %v1303_v20, 0.0  ;;  %v1518_v20 = vpop.permute.xlu0 %1517 }
 0x1fb   : > { %v1243_v22 = vpop.f32.mrf.mxu1  ;;  %v1179_v33 = vadd.f32 %v1178_v2, %v2628_v60  ;;  %v1418_v15 = vmax.f32 %v1368_v47, 0.0 }
 0x1fc   : > { %v1244_v48 = vadd.f32 %v1243_v22, %v2628_v60  ;;  %v1577_v3 = vmul.f32 %v1498_v18, %v1417_v11 }
 0x1fd   : > { %v1423_v34 = vmax.f32 %v1179_v33, 0.0  ;;  %v1578_v39 = vmul.f32 %v1498_v18, %v1418_v15 }
 0x1fe   : > { %v1424_v0 = vmax.f32 %v1244_v48, 0.0 }
 0x1ff   : > { %v1305_v5 = vpop.f32.mrf.mxu2  ;;  %v1583_v10 = vmul.f32 %v1508_v30, %v1423_v34 }
 0x200   : > { %v1370_v16 = vpop.f32.mrf.mxu3  ;;  %v1584_v12 = vmul.f32 %v1508_v30, %v1424_v0  ;;  %v1306_v43 = vadd.f32 %v1305_v5, %v2630_v40 }
 0x201   : > { %v1371_v44 = vadd.f32 %v1370_v16, %v2630_v40  ;;  %v1640_v26 = vadd.f32 %v1639_v52, %v1583_v10 }
 0x202   : > { %v1661_v25 = vadd.f32 %v1660_v19, %v1584_v12  ;;  %v1421_v53 = vmax.f32 %v1306_v43, 0.0  ;;  %v1181_v55 = vpop.f32.mrf.mxu0 }
 0x203   : > { %v1422_v54 = vmax.f32 %v1371_v44, 0.0  ;;  %v1246_v36 = vpop.f32.mrf.mxu1  ;;  %v1182_v14 = vadd.f32 %v1181_v55, %v2635_v56 }
 0x204   : > { %v1581_v50 = vmul.f32 %v1503_v42, %v1421_v53  ;;  %v1247_v57 = vadd.f32 %v1246_v36, %v2635_v56 }
 0x205   : > { %v1582_v31 = vmul.f32 %v1503_v42, %v1422_v54  ;;  %v1427_v63 = vmax.f32 %v1182_v14, 0.0 }
 0x206   : > { %v1681_v17 = vadd.f32 %v1581_v50, %v1577_v3  ;;  %v1428_v51 = vmax.f32 %v1247_v57, 0.0 }
 0x207   : > { %v1702_v27 = vadd.f32 %v1582_v31, %v1578_v39  ;;  %v1308_v40 = vpop.f32.mrf.mxu2  ;;  %v1587_v41 = vmul.f32 %v1513_v4, %v1427_v63 }
 0x208   : > { %v1373_v13 = vpop.f32.mrf.mxu3  ;;  %v1588_v6 = vmul.f32 %v1513_v4, %v1428_v51  ;;  %v1309_v23 = vadd.f32 %v1308_v40, %v2628_v60 }
 0x209   : > { %v1374_v18 = vadd.f32 %v1373_v13, %v2628_v60  ;;  %v1641_v24 = vadd.f32 %v1640_v26, %v1587_v41 }
 0x20a   : > { %v1662_v8 = vadd.f32 %v1661_v25, %v1588_v6  ;;  %v1425_v42 = vmax.f32 %v1309_v23, 0.0  ;;  %v1184_v21 = vpop.f32.mrf.mxu0 }
 0x20b   : > { %v1426_v58 = vmax.f32 %v1374_v18, 0.0  ;;  %v1249_v37 = vpop.f32.mrf.mxu1  ;;  %v1185_v52 = vadd.f32 %v1184_v21, %v2639_v35 }
 0x20c   : > { %v1585_v7 = vmul.f32 %v1508_v30, %v1425_v42  ;;  %v1250_v19 = vadd.f32 %v1249_v37, %v2639_v35 }
 0x20d   : > { %v1586_v38 = vmul.f32 %v1508_v30, %v1426_v58  ;;  %v1431_v22 = vmax.f32 %v1185_v52, 0.0 }
 0x20e   : > { %v1682_v47 = vadd.f32 %v1681_v17, %v1585_v7  ;;  %v1432_v33 = vmax.f32 %v1250_v19, 0.0 }
 0x20f   : > { %v1703_v2 = vadd.f32 %v1702_v27, %v1586_v38  ;;  %v1311_v48 = vpop.f32.mrf.mxu2  ;;  %v1591_v60 = vmul.f32 %v1518_v20, %v1431_v22 }
 0x210   : > { %v1376_v34 = vpop.f32.mrf.mxu3  ;;  %v1592_v0 = vmul.f32 %v1518_v20, %v1432_v33  ;;  %v1312_v11 = vadd.f32 %v1311_v48, %v2635_v56 }
 0x211   : > { %v1377_v15 = vadd.f32 %v1376_v34, %v2635_v56  ;;  %v2688_v5 = vadd.f32 %v1641_v24, %v1591_v60  ;;  %v1523_v34 = vpop.permute.xlu1 %1522 }
 0x212   : > { %v2690_v30 = vadd.f32 %v1662_v8, %v1592_v0  ;;  %v1429_v16 = vmax.f32 %v1312_v11, 0.0  ;;  %v1187_v12 = vpop.f32.mrf.mxu0 }
 0x213   : > { %v1430_v10 = vmax.f32 %v1377_v15, 0.0  ;;  %v1252_v43 = vpop.f32.mrf.mxu1  ;;  %v1188_v7 = vadd.f32 %v1187_v12, %v2637_v61 }
 0x214   : > { %v1589_v44 = vmul.f32 %v1513_v4, %v1429_v16  ;;  %v1253_v38 = vadd.f32 %v1252_v43, %v2637_v61 }
 0x215   : > { %v1590_v26 = vmul.f32 %v1513_v4, %v1430_v10 }
 0x216   : > { %v1683_v25 = vadd.f32 %v1682_v47, %v1589_v44  ;;  %v1436_v47 = vmax.f32 %v1253_v38, 0.0 }
 0x217   : > { %v1704_v53 = vadd.f32 %v1703_v2, %v1590_v26  ;;  %v1314_v54 = vpop.f32.mrf.mxu2 }
 0x218   : > { %v1379_v3 = vpop.f32.mrf.mxu3  ;;  %v1315_v39 = vadd.f32 %v1314_v54, %v2639_v35  ;;  %v1596_v43 = vmul.f32 %v1523_v34, %v1436_v47  ;;  %v1528_v54 = vpop.permute.xlu2 %1527 }
 0x219   : > { %v1380_v55 = vadd.f32 %v1379_v3, %v2639_v35 }
 0x21a   : > { %v1433_v36 = vmax.f32 %v1315_v39, 0.0  ;;  %v1190_v50 = vpop.f32.mrf.mxu0 }
 0x21b   : > { %v1434_v56 = vmax.f32 %v1380_v55, 0.0  ;;  %v1255_v31 = vpop.f32.mrf.mxu1  ;;  %v1191_v2 = vadd.f32 %v1190_v50, %v2644_v62 }
 0x21c   : > { %v1593_v14 = vmul.f32 %v1518_v20, %v1433_v36  ;;  %v1256_v22 = vadd.f32 %v1255_v31, %v2644_v62 }
 0x21d   : > { %v1594_v57 = vmul.f32 %v1518_v20, %v1434_v56  ;;  %v1435_v20 = vmax.f32 %v1188_v7, 0.0  ;;  %v1439_v44 = vmax.f32 %v1191_v2, 0.0  ;;  %v2730_v2 = vpop.permute.xlu1 %1537 }
 0x21e   : > { %v2694_v17 = vadd.f32 %v1683_v25, %v1593_v14  ;;  %v1440_v26 = vmax.f32 %v1256_v22, 0.0  ;;  %v1664_v14 = vadd.f32 %v2690_v30, %v1596_v43 }
 0x21f   : > { %v2696_v27 = vadd.f32 %v1704_v53, %v1594_v57  ;;  %v1317_v63 = vpop.f32.mrf.mxu2  ;;  %v1595_v12 = vmul.f32 %v1523_v34, %v1435_v20  ;;  %v1599_v57 = vmul.f32 %v1528_v54, %v1439_v44 }
 0x220   : > { %v1382_v4 = vpop.f32.mrf.mxu3  ;;  %v1318_v60 = vadd.f32 %v1317_v63, %v2637_v61  ;;  %v1600_v63 = vmul.f32 %v1528_v54, %v1440_v26  ;;  %v1543_v26 = vpop.permute.xlu2 %1542 }
 0x221   : > { %v1383_v0 = vadd.f32 %v1382_v4, %v2637_v61 }
 0x222   : > { %v1193_v51 = vpop.f32.mrf.mxu0  ;;  %v1437_v3 = vmax.f32 %v1318_v60, 0.0 }
 0x223   : > { %v1258_v40 = vpop.f32.mrf.mxu1  ;;  %v1194_v11 = vadd.f32 %v1193_v51, %v2648_v49  ;;  %v1438_v39 = vmax.f32 %v1383_v0, 0.0 }
 0x224   : > { %v1259_v15 = vadd.f32 %v1258_v40, %v2648_v49  ;;  %v1533_v40 = vpop.permute.xlu0 %1532 }
 0x225   : > { %v1443_v61 = vmax.f32 %v1194_v11, 0.0  ;;  %v1665_v11 = vadd.f32 %v1664_v14, %v1600_v63 }
 0x226   : > { %v1444_v55 = vmax.f32 %v1259_v15, 0.0 }
 0x227   : > { %v1320_v13 = vpop.f32.mrf.mxu2 }
 0x228   : > { %v1385_v41 = vpop.f32.mrf.mxu3  ;;  %v1321_v16 = vadd.f32 %v1320_v13, %v2644_v62  ;;  %v1597_v13 = vmul.f32 %v1523_v34, %v1437_v3  ;;  %v1604_v20 = vmul.f32 %v1533_v40, %v1444_v55 }
 0x229   : > { %v1386_v10 = vadd.f32 %v1385_v41, %v2644_v62  ;;  %v1643_v62 = vadd.f32 %v2688_v5, %v1595_v12  ;;  %v1598_v41 = vmul.f32 %v1523_v34, %v1438_v39 }
 0x22a   : > { %v1196_v6 = vpop.f32.mrf.mxu0  ;;  %v1441_v50 = vmax.f32 %v1321_v16, 0.0  ;;  %v1685_v16 = vadd.f32 %v2694_v17, %v1597_v13 }
 0x22b   : > { %v1261_v23 = vpop.f32.mrf.mxu1  ;;  %v1197_v36 = vadd.f32 %v1196_v6, %v2646_v1  ;;  %v1442_v31 = vmax.f32 %v1386_v10, 0.0  ;;  %v1603_v6 = vmul.f32 %v1533_v40, %v1443_v61  ;;  %v1644_v0 = vadd.f32 %v1643_v62, %v1599_v57 }
 0x22c   : > { %v1262_v56 = vadd.f32 %v1261_v23, %v2646_v1  ;;  %v1601_v5 = vmul.f32 %v1528_v54, %v1441_v50  ;;  %v1706_v10 = vadd.f32 %v2696_v27, %v1598_v41 }
 0x22d   : > { %v1447_v23 = vmax.f32 %v1197_v36, 0.0  ;;  %v1602_v22 = vmul.f32 %v1528_v54, %v1442_v31  ;;  %v1645_v44 = vadd.f32 %v1644_v0, %v1603_v6 }
 0x22e   : > { %v1448_v47 = vmax.f32 %v1262_v56, 0.0 }
 0x22f   : > { %v1323_v18 = vpop.f32.mrf.mxu2  ;;  %v1707_v54 = vadd.f32 %v1706_v10, %v1602_v22 }
 0x230   : > { %v1388_v35 = vpop.f32.mrf.mxu3  ;;  %v1324_v30 = vadd.f32 %v1323_v18, %v2648_v49  ;;  %v1666_v18 = vadd.f32 %v1665_v11, %v1604_v20 }
 0x231   : > { %v1389_v60 = vadd.f32 %v1388_v35, %v2648_v49  ;;  %v1607_v49 = vmul.f32 %v2730_v2, %v1447_v23  ;;  %v1608_v35 = vmul.f32 %v2730_v2, %v1448_v47 }
 0x232   : > { %v1199_v24 = vpop.f32.mrf.mxu0 }
 0x233   : > { %v1264_v8 = vpop.f32.mrf.mxu1  ;;  %v1200_v7 = vadd.f32 %v1199_v24, %v2653_v29  ;;  %v1446_v3 = vmax.f32 %v1389_v60, 0.0  ;;  %v1646_v14 = vadd.f32 %v1645_v44, %v1607_v49  ;;  %v1667_v57 = vadd.f32 %v1666_v18, %v1608_v35  ;;  %v2768_v44 = vpop.permute.xlu2 %1557 }
 0x234   : > { %v1265_v38 = vadd.f32 %v1264_v8, %v2653_v29 }
 0x235   : > { %v1451_v12 = vmax.f32 %v1200_v7, 0.0  ;;  %v1606_v13 = vmul.f32 %v1533_v40, %v1446_v3 }
 0x236   : > { %v1452_v43 = vmax.f32 %v1265_v38, 0.0 }
 0x237   : > { %v2698_v42 = vpop.f32.mrf.mxu2  ;;  %v1611_v56 = vmul.f32 %v1543_v26, %v1451_v12  ;;  %v1708_v60 = vadd.f32 %v1707_v54, %v1606_v13 }
 0x238   : > { %v2700_v58 = vpop.f32.mrf.mxu3  ;;  %v1327_v39 = vadd.f32 %v2698_v42, %v2646_v1  ;;  %v1612_v50 = vmul.f32 %v1543_v26, %v1452_v43 }
 0x239   : > { %v1392_v17 = vadd.f32 %v2700_v58, %v2646_v1  ;;  %v2756_v58 = vpop.permute.xlu0 %1547  ;;  %v1647_v47 = vadd.f32 %v1646_v14, %v1611_v56 }
 0x23a   : > { %v1202_v21 = vpop.f32.mrf.mxu0 }
 0x23b   : > { %v1267_v37 = vpop.f32.mrf.mxu1  ;;  %v1203_v34 = vadd.f32 %v1202_v21, %v2657_v9  ;;  %v1686_v21 = vadd.f32 %v1685_v16, %v1601_v5  ;;  %v1450_v38 = vmax.f32 %v1392_v17, 0.0 }
 0x23c   : > { %v1268_v24 = vadd.f32 %v1267_v37, %v2657_v9  ;;  %v1445_v37 = vmax.f32 %v1324_v30, 0.0 }
 0x23d   : > { %v1455_v27 = vmax.f32 %v1203_v34, 0.0 }
 0x23e   : > { %v1456_v61 = vmax.f32 %v1268_v24, 0.0  ;;  %v1605_v63 = vmul.f32 %v1533_v40, %v1445_v37  ;;  %v1610_v24 = vmul.f32 %v2730_v2, %v1450_v38 }
 0x23f   : > { %v2704_v52 = vpop.f32.mrf.mxu2 }
 0x240   : > { %v2706_v19 = vpop.f32.mrf.mxu3  ;;  %v1330_v42 = vadd.f32 %v2704_v52, %v2653_v29  ;;  %v1616_v6 = vmul.f32 %v2756_v58, %v1456_v61  ;;  %v2762_v52 = vpop.permute.xlu1 %1552  ;;  %v1687_v30 = vadd.f32 %v1686_v21, %v1605_v63 }
 0x241   : > { %v1395_v1 = vadd.f32 %v2706_v19, %v2653_v29  ;;  %v1668_v29 = vadd.f32 %v1667_v57, %v1612_v50  ;;  %v1563_v14 = vpop.permute.xlu0 %1562 }
 0x242   : > { %v2710_v33 = vpop.f32.mrf.mxu0  ;;  %v1453_v22 = vmax.f32 %v1330_v42, 0.0 }
 0x243   : > { %v2712_v48 = vpop.f32.mrf.mxu1  ;;  %v1206_v31 = vadd.f32 %v2710_v33, %v2655_v59  ;;  %v1449_v33 = vmax.f32 %v1327_v39, 0.0  ;;  %v1454_v40 = vmax.f32 %v1395_v1, 0.0  ;;  %v1669_v10 = vadd.f32 %v1668_v29, %v1616_v6 }
 0x244   : > { %v1271_v62 = vadd.f32 %v2712_v48, %v2655_v59  ;;  %v1615_v48 = vmul.f32 %v2756_v58, %v1455_v27  ;;  %v1613_v54 = vmul.f32 %v1543_v26, %v1453_v22 }
 0x245   : > { %v1459_v19 = vmax.f32 %v1206_v31, 0.0  ;;  %v1609_v34 = vmul.f32 %v2730_v2, %v1449_v33  ;;  %v1614_v37 = vmul.f32 %v1543_v26, %v1454_v40 }
 0x246   : > { %v1460_v5 = vmax.f32 %v1271_v62, 0.0  ;;  %v1648_v16 = vadd.f32 %v1647_v47, %v1615_v48 }
 0x247   : > { %v2720_v25 = vpop.f32.mrf.mxu2  ;;  %v1619_v18 = vmul.f32 %v2762_v52, %v1459_v19 }
 0x248   : > { %v2722_v53 = vpop.f32.mrf.mxu3  ;;  %v1620_v49 = vmul.f32 %v2762_v52, %v1460_v5  ;;  %v1333_v2 = vadd.f32 %v2720_v25, %v2657_v9  ;;  %v1568_v13 = vpop.permute.xlu1 %1567 }
 0x249   : > { %v1398_v17 = vadd.f32 %v2722_v53, %v2657_v9  ;;  %v1649_v26 = vadd.f32 %v1648_v16, %v1619_v18 }
 0x24a   : > { %v1208_v4 = vpop.f32.mrf.mxu0  ;;  %v1670_v57 = vadd.f32 %v1669_v10, %v1620_v49 }
 0x24b   : > { %v1273_v51 = vpop.f32.mrf.mxu1  ;;  %v1209_v41 = vadd.f32 %v1208_v4, %v2662_v32 }
 0x24c   : > { %v1274_v7 = vadd.f32 %v1273_v51, %v2662_v32 }
 0x24d   : > { %v1463_v0 = vmax.f32 %v1209_v41, 0.0  ;;  %v1457_v41 = vmax.f32 %v1333_v2, 0.0 }
 0x24e   : > { %v1464_v11 = vmax.f32 %v1274_v7, 0.0  ;;  %v1458_v7 = vmax.f32 %v1398_v17, 0.0 }
 0x24f   : > { %v2736_v15 = vpop.f32.mrf.mxu2  ;;  %v1623_v27 = vmul.f32 %v2768_v44, %v1463_v0 }
 0x250   : > { %v2738_v8 = vpop.f32.mrf.mxu3  ;;  %v1624_v61 = vmul.f32 %v2768_v44, %v1464_v11  ;;  %v1336_v42 = vadd.f32 %v2736_v15, %v2655_v59 }
 0x251   : > { %v1401_v25 = vadd.f32 %v2738_v8, %v2655_v59  ;;  %v1650_v33 = vadd.f32 %v1649_v26, %v1623_v27 }
 0x252   : > { %v1211_v55 = vpop.f32.mrf.mxu0  ;;  %v1671_v38 = vadd.f32 %v1670_v57, %v1624_v61  ;;  %v1461_v5 = vmax.f32 %v1336_v42, 0.0 }
 0x253   : > { %v1276_v36 = vpop.f32.mrf.mxu1  ;;  %v1212_v4 = vadd.f32 %v1211_v55, %v2666_v46  ;;  %v1688_v55 = vadd.f32 %v1687_v30, %v1609_v34  ;;  %v1462_v22 = vmax.f32 %v1401_v25, 0.0 }
 0x254   : > { %v1277_v51 = vadd.f32 %v1276_v36, %v2666_v46  ;;  %v1709_v36 = vadd.f32 %v1708_v60, %v1610_v24  ;;  %v1573_v60 = vpop.permute.xlu2 %1572 }
 0x255   : > { %v1467_v3 = vmax.f32 %v1212_v4, 0.0  ;;  %v1689_v9 = vadd.f32 %v1688_v55, %v1613_v54 }
 0x256   : > { %v1468_v39 = vmax.f32 %v1277_v51, 0.0  ;;  %v1710_v53 = vadd.f32 %v1709_v36, %v1614_v37 }
 0x257   : > { %v1338_v20 = vpop.f32.mrf.mxu2  ;;  %v1627_v1 = vmul.f32 %v1563_v14, %v1467_v3 }
 0x258   : > { %v1403_v23 = vpop.f32.mrf.mxu3  ;;  %v1628_v63 = vmul.f32 %v1563_v14, %v1468_v39  ;;  %v1339_v48 = vadd.f32 %v1338_v20, %v2662_v32  ;;  %v1617_v20 = vmul.f32 %v2756_v58, %v1457_v41 }
 0x259   : > { %v1404_v6 = vadd.f32 %v1403_v23, %v2662_v32  ;;  %v1651_v40 = vadd.f32 %v1650_v33, %v1627_v1  ;;  %v1618_v32 = vmul.f32 %v2756_v58, %v1458_v7 }
 0x25a   : > { %v1214_v12 = vpop.f32.mrf.mxu0  ;;  %v1672_v4 = vadd.f32 %v1671_v38, %v1628_v63  ;;  %v1465_v11 = vmax.f32 %v1339_v48, 0.0  ;;  %v1690_v37 = vadd.f32 %v1689_v9, %v1617_v20  ;;  %v1727_v48 = vpop.permute.xlu0 %1726 }
 0x25b   : > { %v1279_v43 = vpop.f32.mrf.mxu1  ;;  %v1215_v35 = vadd.f32 %v1214_v12, %v2664_v45  ;;  %v1466_v34 = vmax.f32 %v1404_v6, 0.0  ;;  %v1711_v3 = vadd.f32 %v1710_v53, %v1618_v32 }
 0x25c   : > { %v1280_v21 = vadd.f32 %v1279_v43, %v2664_v45  ;;  %v1625_v17 = vmul.f32 %v2768_v44, %v1465_v11 }
 0x25d   : > { %v1471_v56 = vmax.f32 %v1215_v35, 0.0  ;;  %v1626_v27 = vmul.f32 %v2768_v44, %v1466_v34 }
 0x25e   : > { %v1472_v50 = vmax.f32 %v1280_v21, 0.0  ;;  %v1622_v21 = vmul.f32 %v2762_v52, %v1462_v22 }
 0x25f   : > { %v1341_v31 = vpop.f32.mrf.mxu2  ;;  %v1631_v47 = vmul.f32 %v1568_v13, %v1471_v56 }
 0x260   : > { %v1406_v62 = vpop.f32.mrf.mxu3  ;;  %v1632_v29 = vmul.f32 %v1568_v13, %v1472_v50  ;;  %v1342_v51 = vadd.f32 %v1341_v31, %v2666_v46 }
 0x261   : > { %v1407_v30 = vadd.f32 %v1406_v62, %v2666_v46  ;;  %v1652_v24 = vadd.f32 %v1651_v40, %v1631_v47  ;;  %v1621_v46 = vmul.f32 %v2762_v52, %v1461_v5 }
 0x262   : > { %v1217_v19 = vpop.f32.mrf.mxu0  ;;  %v1673_v16 = vadd.f32 %v1672_v4, %v1632_v29  ;;  %v1469_v54 = vmax.f32 %v1342_v51, 0.0 }
 0x263   : > { %v1282_v15 = vpop.f32.mrf.mxu1  ;;  %v1218_v59 = vadd.f32 %v1217_v19, %v2670_v28  ;;  %v1470_v58 = vmax.f32 %v1407_v30, 0.0  ;;  %v1691_v50 = vadd.f32 %v1690_v37, %v1621_v46  ;;  %v1748_v46 = vlaneseq }
 0x264   : > { %v1283_v8 = vadd.f32 %v1282_v15, %v2670_v28  ;;  %v1629_v31 = vmul.f32 %v1563_v14, %v1469_v54 }
 0x265   : > { %v1475_v23 = vmax.f32 %v1218_v59, 0.0  ;;  %v1630_v62 = vmul.f32 %v1563_v14, %v1470_v58  ;;  %v1692_v57 = vadd.f32 %v1691_v50, %v1625_v17  ;;  %vm1750_vm4 = vcmp.lt.s32.totalorder %v1748_v46, 512 }
 0x266   : > { %v1476_v0 = vmax.f32 %v1283_v8, 0.0  ;;  %v1729_v8 = vperm.slane %v1727_v48, 0 }
 0x267   : > { %v1344_v10 = vpop.f32.mrf.mxu2  ;;  %v1635_v43 = vmul.f32 %v1573_v60, %v1475_v23  ;;  %v1693_v33 = vadd.f32 %v1692_v57, %v1629_v31 }
 0x268   : > { %v1409_v12 = vpop.f32.mrf.mxu3  ;;  %v1636_v18 = vmul.f32 %v1573_v60, %v1476_v0  ;;  %v1345_v49 = vadd.f32 %v1344_v10, %v2664_v45 }
 0x269   : > { %v1410_v35 = vadd.f32 %v1409_v12, %v2664_v45  ;;  %v1653_v39 = vadd.f32 %v1652_v24, %v1635_v43  ;;  %v1712_v45 = vadd.f32 %v1711_v3, %v1622_v21 }
 0x26a   : > { %v1674_v2 = vadd.f32 %v1673_v16, %v1636_v18  ;;  %v1473_v61 = vmax.f32 %v1345_v49, 0.0 }
 0x26b   : > { %v1474_v55 = vmax.f32 %v1410_v35, 0.0  ;;  %v1654_v36 = vrot.slane %v1653_v39, 4  ;;  %v1713_v42 = vadd.f32 %v1712_v45, %v1626_v27 }
 0x26c   : > { %v1675_v56 = vrot.slane %v1674_v2, 4  ;;  %v1633_v25 = vmul.f32 %v1568_v13, %v1473_v61 }
 0x26d   : > { %v1655_v26 = vadd.f32 %v1654_v36, %v1653_v39  ;;  %v1634_v9 = vmul.f32 %v1568_v13, %v1474_v55  ;;  %v1714_v38 = vadd.f32 %v1713_v42, %v1630_v62 }
 0x26e   : > { %v1676_v52 = vadd.f32 %v1675_v56, %v1674_v2  ;;  %v1694_v19 = vadd.f32 %v1693_v33, %v1633_v25 }
 0x26f   : > { %v1347_v53 = vpop.f32.mrf.mxu2  ;;  %v1656_v63 = vrot.slane %v1655_v26, 2  ;;  %v1715_v15 = vadd.f32 %v1714_v38, %v1634_v9 }
 0x270   : > { %v1412_v1 = vpop.f32.mrf.mxu3  ;;  %v1677_v41 = vrot.slane %v1676_v52, 2  ;;  %v1348_v44 = vadd.f32 %v1347_v53, %v2670_v28 }
 0x271   : > { %v1413_v7 = vadd.f32 %v1412_v1, %v2670_v28  ;;  %v1657_v6 = vadd.f32 %v1656_v63, %v1655_v26 }
 0x272   : > { %v1678_v47 = vadd.f32 %v1677_v41, %v1676_v52  ;;  %v1477_v14 = vmax.f32 %v1348_v44, 0.0 }
 0x273   : > { %v1478_v29 = vmax.f32 %v1413_v7, 0.0  ;;  %v1658_v5 = vrot.slane %v1657_v6, 1 }
 0x274   : > { %v1679_v22 = vrot.slane %v1678_v47, 1  ;;  %v1637_v13 = vmul.f32 %v1573_v60, %v1477_v14 }
 0x275   : > { %v1638_v59 = vmul.f32 %v1573_v60, %v1478_v29  ;;  %v1659_v40 = vadd.f32 %v1658_v5, %v1657_v6 }
 0x276   : > { %v1680_v4 = vadd.f32 %v1679_v22, %v1678_v47  ;;  %v1695_v51 = vadd.f32 %v1694_v19, %v1637_v13 }
 0x277   : > { %v1716_v30 = vadd.f32 %v1715_v15, %v1638_v59  ;;  %v1730_v23 = vadd.f32 %v1729_v8, %v1659_v40 }
 0x278   : > { %v1731_v28 = vadd.f32 %v1729_v8, %v1680_v4  ;;  %v1696_v20 = vrot.slane %v1695_v51, 4 }
 0x279   : > { %v1717_v32 = vrot.slane %v1716_v30, 4 }
 0x27a   : > { %v1738_v0 = vrot.slane %v1731_v28, 7  ;;  %v1697_v11 = vadd.f32 %v1696_v20, %v1695_v51 }
 0x27b   : > { %v1718_v34 = vadd.f32 %v1717_v32, %v1716_v30 }
 0x27c   : > { %v1742_v24 = vsel %vm1741_vm1, %v1730_v23, %v1738_v0  ;;  %v1698_v16 = vrot.slane %v1697_v11, 2 }
 0x27d   : > { %v1719_v10 = vrot.slane %v1718_v34, 2 }
 0x27e   : > { %v1699_v60 = vadd.f32 %v1698_v16, %v1697_v11 }
 0x27f   : > { %v1720_v12 = vadd.f32 %v1719_v10, %v1718_v34 }
 0x280   : > { %v1700_v43 = vrot.slane %v1699_v60, 1 }
 0x281   : > { %v1721_v18 = vrot.slane %v1720_v12, 1 }
 0x282   : > { %v1701_v49 = vadd.f32 %v1700_v43, %v1699_v60 }
 0x283   : > { %v1722_v35 = vadd.f32 %v1721_v18, %v1720_v12 }
 0x284   : > { %v1732_v21 = vadd.f32 %v1729_v8, %v1701_v49 }
 0x285   : > { %v1733_v54 = vadd.f32 %v1729_v8, %v1722_v35 }
 0x286   : > { %v1739_v58 = vrot.slane %v1732_v21, 6 }
 0x287   : > { %v1740_v37 = vrot.slane %v1733_v54, 5 }
 0x289   : > { %v1744_v3 = vsel %vm1743_vm2, %v1739_v58, %v1740_v37 }
 0x28a   : > { %v1746_v39 = vsel %vm1745_vm3, %v1742_v24, %v1744_v3 }
 0x28b   : > { %1752 = vst.msk [vmem:[%s300_s27] sm:$0xf] %vm1750_vm4, %v1746_v39 }
 0x28c PF: > { %s19_s26 = sadd.s32 1, %s1959_s26  }
 0x28d   : > { %p16_p5 = scmp.ge.s32.totalorder %s19_s26, 4  }
 0x28f   :  { %18 = sbr.rel (!%p16_p5) target bundleno = 3 (0x3), region = 78 }

</bundles_post_ra>
